<compile_context>
chip_gen: v5e
topology: v5e:2x2
jax: 0.10.0
libtpu: 0.0.40
codegen_flags: <defaults>
</compile_context>

<pallas_src>
import functools

import numpy as np
import jax
import jax.numpy as jnp
from jax import lax
from jax.experimental import pallas as pl
from jax.experimental.pallas import tpu as pltpu


# ---------------------------- module bookkeeping ----------------------------

def _module_names(depth):
    names = []

    def gen(level):
        names.append(f"b1_{level}")
        names.append(f"b2_{level}")
        if level > 1:
            gen(level - 1)
        else:
            names.append(f"b2_plus_{level}")
        names.append(f"b3_{level}")

    gen(depth)
    return names


def init_hourglass_params(key, depth, num_features):
    """Deterministic synthetic weights; each block is conv3x3 (HWIO) + bias."""
    params = {}
    for i, name in enumerate(_module_names(depth)):
        kw, kb = jax.random.split(jax.random.fold_in(key, i))
        params[name] = (
            0.1 * jax.random.normal(kw, (3, 3, num_features, num_features),
                                    jnp.float32),
            0.1 * jax.random.normal(kb, (num_features,), jnp.float32),
        )
    return params


def _pool_upsample_mats(h, w):
    """P: (h*w, h*w/4) avg-pool-2x2 matrix; U: nearest-2x-upsample matrix."""
    ho, wo = h // 2, w // 2
    p = np.zeros((h * w, ho * wo), np.float32)
    for hh in range(h):
        for ww in range(w):
            p[hh * w + ww, (hh // 2) * wo + (ww // 2)] = 0.25
    u = np.ascontiguousarray(4.0 * p.T)
    return jnp.asarray(p), jnp.asarray(u)


# ---------------------------- in-kernel helpers ----------------------------

def _divmod_fast(x, d):
    """divmod by a static positive int; bit ops when d is a power of two."""
    if d & (d - 1) == 0:
        return x >> (d.bit_length() - 1), x & (d - 1)
    return x // d, x % d


def _make_tap_meta(bt, hh, ww):
    """Tap shifts + boundary masks for one resolution, computed ONCE and shared
    by every conv at that resolution (masks are per-image-position, so they also
    cut the cyclic roll wrap-around between the bt images on the lane axis)."""
    hw = hh * ww
    L = bt * hw
    lane = lax.broadcasted_iota(jnp.int32, (1, L), 1)
    _, pos = _divmod_fast(lane, hw)          # position within each image
    row, col = _divmod_fast(pos, ww)
    masks, shifts = [], []
    for dh in (-1, 0, 1):
        for dw in (-1, 0, 1):
            conds = []
            if dh == -1:
                conds.append(row >= 1)
            elif dh == 1:
                conds.append(row <= hh - 2)
            if dw == -1:
                conds.append(col >= 1)
            elif dw == 1:
                conds.append(col <= ww - 2)
            masks.append(functools.reduce(jnp.logical_and, conds)
                         if conds else None)
            shifts.append((-(dh * ww + dw)) % L)
    return masks, shifts


def _conv3x3_relu(x, w_ref, b_ref, bi, masks, shifts):
    """ReLU(conv3x3_same(x) + b) as ONE MXU matmul.

    x      : (C_in, L) f32 value, L = batch_tile * h * w (lane axis).
    w_ref  : (num_blocks, C_out, 9*C_in) VMEM ref, tap-major (dh, dw) order.
    b_ref  : (num_blocks, C_out, 1)      VMEM ref.
    """
    taps = []
    for k in range(9):
        shift = shifts[k]
        # shifted[p] = x[p + off] (cyclic; out-of-bounds taps masked below)
        t = x if shift == 0 else pltpu.roll(x, shift=shift, axis=1)
        m = masks[k]
        if m is not None:
            t = jnp.where(m, t, 0.0)
        taps.append(t)
    stacked = jnp.concatenate(taps, axis=0)               # (9*C_in, L)
    y = jnp.dot(w_ref[bi], stacked, preferred_element_type=jnp.float32)
    return jnp.maximum(y + b_ref[bi], 0.0)


def _hourglass_kernel(depth, h, w, bt, name_to_idx, x_ref, w_ref, b_ref, *rest):
    # rest = (P_depth, U_depth, ..., P_1, U_1, out_ref)
    pu_refs = rest[:-1]
    o_ref = rest[-1]
    c = x_ref.shape[0]

    # Hoisted tap metadata: one set per distinct conv resolution (depth+1).
    meta = {}
    hh, ww = h, w
    for _ in range(depth + 1):
        meta[(hh, ww)] = _make_tap_meta(bt, hh, ww)
        hh, ww = hh // 2, ww // 2

    def conv(x, name, hh, ww):
        masks, shifts = meta[(hh, ww)]
        return _conv3x3_relu(x, w_ref, b_ref, name_to_idx[name], masks, shifts)

    def pool(x, p_ref, hw_in):
        # per-image avg-pool 2x2: (C*bt, hw_in) @ (hw_in, hw_in/4)
        xr = x.reshape(c * bt, hw_in)
        y = jnp.dot(xr, p_ref[...], preferred_element_type=jnp.float32)
        return y.reshape(c, bt * (hw_in // 4))

    def upsample(x, u_ref, hw_low):
        # per-image nearest 2x: (C*bt, hw_low) @ (hw_low, 4*hw_low)
        xr = x.reshape(c * bt, hw_low)
        y = jnp.dot(xr, u_ref[...], preferred_element_type=jnp.float32)
        return y.reshape(c, bt * hw_low * 4)

    def level_fn(level, x, hh, ww):
        li = depth - level
        p_ref = pu_refs[2 * li]
        u_ref = pu_refs[2 * li + 1]

        up1 = conv(x, f"b1_{level}", hh, ww)
        low1 = conv(pool(x, p_ref, hh * ww), f"b2_{level}", hh // 2, ww // 2)
        if level > 1:
            low2 = level_fn(level - 1, low1, hh // 2, ww // 2)
        else:
            low2 = conv(low1, f"b2_plus_{level}", hh // 2, ww // 2)
        low3 = conv(low2, f"b3_{level}", hh // 2, ww // 2)
        up2 = upsample(low3, u_ref, (hh // 2) * (ww // 2))
        return up1 + up2

    o_ref[...] = level_fn(depth, x_ref[...], h, w).astype(o_ref.dtype)


# ---------------------------- Pallas wrapper ----------------------------

def hourglass_forward(params, depth, x_nchw):
    n, c, h, w = x_nchw.shape
    assert h % (1 << depth) == 0 and w % (1 << depth) == 0

    # Batch tile: split the batch over (at most) two grid steps so both v7x
    # TensorCores get work; v5e/v6e simply loop over the 1-2 grid steps.
    batch_tile = max(1, (n + 1) // 2)
    if n % batch_tile != 0 or (batch_tile * h * w) % 128 != 0:
        batch_tile = n                      # single lane-dense step
    grid_n = n // batch_tile

    names = _module_names(depth)
    name_to_idx = {nm: i for i, nm in enumerate(names)}

    # HWIO (3,3,Cin,Cout) -> (Cout, 9*Cin), tap-major (dh, dw): lane-dense pack.
    w_all = jnp.stack([
        jnp.transpose(params[nm][0], (3, 0, 1, 2)).reshape(c, 9 * c)
        for nm in names])                                     # (nb, Cout, 9*Cin)
    b_all = jnp.stack([params[nm][1].reshape(c, 1) for nm in names])  # (nb, C, 1)

    pu = []
    hh, ww = h, w
    for _ in range(depth):
        p_mat, u_mat = _pool_upsample_mats(hh, ww)
        pu += [p_mat, u_mat]
        hh, ww = hh // 2, ww // 2

    # (N, C, H, W) -> (C, N*H*W): channels on sublanes, batch*spatial on lanes.
    x_cl = jnp.transpose(x_nchw, (1, 0, 2, 3)).reshape(c, n * h * w)
    lane_blk = batch_tile * h * w

    def const_spec(arr):
        nd = arr.ndim
        return pl.BlockSpec(arr.shape, lambda i, _nd=nd: (0,) * _nd)

    in_specs = ([pl.BlockSpec((c, lane_blk), lambda i: (0, i)),
                 const_spec(w_all), const_spec(b_all)]
                + [const_spec(m) for m in pu])

    kernel = functools.partial(_hourglass_kernel, depth, h, w, batch_tile,
                               name_to_idx)

    y = pl.pallas_call(
        kernel,
        out_shape=jax.ShapeDtypeStruct((c, n * h * w), x_nchw.dtype),
        grid=(grid_n,),
        in_specs=in_specs,
        out_specs=pl.BlockSpec((c, lane_blk), lambda i: (0, i)),
        compiler_params=pltpu.CompilerParams(
            dimension_semantics=("parallel",)),
    )(x_cl, w_all, b_all, *pu)

    return jnp.transpose(y.reshape(c, n, h, w), (1, 0, 2, 3))


# ---------------------------- pure-JAX reference ----------------------------

def _conv_block_ref(x, w_hwio, b):
    y = lax.conv_general_dilated(
        x, w_hwio, window_strides=(1, 1), padding="SAME",
        dimension_numbers=("NCHW", "HWIO", "NCHW"),
        precision=lax.Precision.HIGHEST)
    return jnp.maximum(y + b.reshape(1, -1, 1, 1), 0.0)


def _avg_pool_ref(x):
    n, c, h, w = x.shape
    return x.reshape(n, c, h // 2, 2, w // 2, 2).mean(axis=(3, 5))


def _up_add_ref(low, up1):
    return jnp.repeat(jnp.repeat(low, 2, axis=2), 2, axis=3) + up1


def _hourglass_ref_level(params, level, x):
    up1 = _conv_block_ref(x, *params[f"b1_{level}"])
    low1 = _avg_pool_ref(x)
    low1 = _conv_block_ref(low1, *params[f"b2_{level}"])
    if level > 1:
        low2 = _hourglass_ref_level(params, level - 1, low1)
    else:
        low2 = _conv_block_ref(low1, *params[f"b2_plus_{level}"])
    low3 = _conv_block_ref(low2, *params[f"b3_{level}"])
    return _up_add_ref(low3, up1)


def hourglass_ref(params, depth, x_nchw):
    return _hourglass_ref_level(params, depth, x_nchw)


# ---------------------------- main ----------------------------

if __name__ == "__main__":
    # HourGlassBlock(block=Conv3x3+ReLU, num_modules=1, depth=2, num_features=8)
    num_modules = 1   # stored by the module but unused in forward
    depth = 2
    num_features = 8
    batch, spatial = 2, 16

    key = jax.random.PRNGKey(0)
    kx, kp = jax.random.split(key)
    x = jax.random.normal(kx, (batch, num_features, spatial, spatial),
                          jnp.float32)                 # NCHW, like PyTorch
    params = init_hourglass_params(kp, depth, num_features)

    fwd = jax.jit(hourglass_forward, static_argnums=1)
    out = jax.block_until_ready(fwd(params, depth, x))

    ref = jax.block_until_ready(hourglass_ref(params, depth, x))
    assert out.shape == x.shape and out.dtype == jnp.float32
    max_err = float(jnp.max(jnp.abs(out - ref)))
    # f32 MXU path (multi-pass bf16) vs Precision.HIGHEST reference.
    assert max_err < 2e-4, f"mismatch vs reference, max_err={max_err}"

    print("KERNEL_OK")
</pallas_src>

<mosaic_0001>
module attributes {stable_mosaic.version = 11 : i64} {
  func.func @_hourglass_kernel(%arg0: i32, %arg1: memref<8x256xf32, #tpu.memory_space<vmem>>, %arg2: memref<7x8x72xf32, #tpu.memory_space<vmem>>, %arg3: memref<7x8x1xf32, #tpu.memory_space<vmem>>, %arg4: memref<256x64xf32, #tpu.memory_space<vmem>>, %arg5: memref<64x256xf32, #tpu.memory_space<vmem>>, %arg6: memref<64x16xf32, #tpu.memory_space<vmem>>, %arg7: memref<16x64xf32, #tpu.memory_space<vmem>>, %arg8: memref<8x256xf32, #tpu.memory_space<vmem>>) attributes {dimension_semantics = [#tpu.dimension_semantics<parallel>], iteration_bounds = array<i64: 2>, scalar_prefetch = 0 : i64, scratch_operands = 0 : i64, tpu.core_type = #tpu.core_type<tc>, window_params = [{transform_indices = @transform_0, window_bounds = array<i64: 8, 256>}, {pipeline_mode = #tpu.pipeline_mode<synchronous>, transform_indices = @transform_1, window_bounds = array<i64: 7, 8, 72>}, {pipeline_mode = #tpu.pipeline_mode<synchronous>, transform_indices = @transform_2, window_bounds = array<i64: 7, 8, 1>}, {pipeline_mode = #tpu.pipeline_mode<synchronous>, transform_indices = @transform_3, window_bounds = array<i64: 256, 64>}, {pipeline_mode = #tpu.pipeline_mode<synchronous>, transform_indices = @transform_4, window_bounds = array<i64: 64, 256>}, {pipeline_mode = #tpu.pipeline_mode<synchronous>, transform_indices = @transform_5, window_bounds = array<i64: 64, 16>}, {pipeline_mode = #tpu.pipeline_mode<synchronous>, transform_indices = @transform_6, window_bounds = array<i64: 16, 64>}, {transform_indices = @transform_7, window_bounds = array<i64: 8, 256>}]} {
    %0 = tpu.iota {dimensions = array<i32: 1>} : vector<1x256xi32>
    %c255_i32 = arith.constant 255 : i32
    %1 = vector.broadcast %c255_i32 : i32 to vector<1x256xi32>
    %2 = arith.andi %0, %1 : vector<1x256xi32>
    %c4_i32 = arith.constant 4 : i32
    %3 = vector.broadcast %c4_i32 : i32 to vector<1x256xi32>
    %4 = arith.shrsi %2, %3 : vector<1x256xi32>
    %c15_i32 = arith.constant 15 : i32
    %5 = vector.broadcast %c15_i32 : i32 to vector<1x256xi32>
    %6 = arith.andi %2, %5 : vector<1x256xi32>
    %c1_i32 = arith.constant 1 : i32
    %7 = vector.broadcast %c1_i32 : i32 to vector<1x256xi32>
    %8 = arith.cmpi sge, %4, %7 : vector<1x256xi32>
    %c1_i32_0 = arith.constant 1 : i32
    %9 = vector.broadcast %c1_i32_0 : i32 to vector<1x256xi32>
    %10 = arith.cmpi sge, %6, %9 : vector<1x256xi32>
    %11 = arith.andi %8, %10 : vector<1x256xi1>
    %c1_i32_1 = arith.constant 1 : i32
    %12 = vector.broadcast %c1_i32_1 : i32 to vector<1x256xi32>
    %13 = arith.cmpi sge, %4, %12 : vector<1x256xi32>
    %c1_i32_2 = arith.constant 1 : i32
    %14 = vector.broadcast %c1_i32_2 : i32 to vector<1x256xi32>
    %15 = arith.cmpi sge, %4, %14 : vector<1x256xi32>
    %c14_i32 = arith.constant 14 : i32
    %16 = vector.broadcast %c14_i32 : i32 to vector<1x256xi32>
    %17 = arith.cmpi sle, %6, %16 : vector<1x256xi32>
    %18 = arith.andi %15, %17 : vector<1x256xi1>
    %c1_i32_3 = arith.constant 1 : i32
    %19 = vector.broadcast %c1_i32_3 : i32 to vector<1x256xi32>
    %20 = arith.cmpi sge, %6, %19 : vector<1x256xi32>
    %c14_i32_4 = arith.constant 14 : i32
    %21 = vector.broadcast %c14_i32_4 : i32 to vector<1x256xi32>
    %22 = arith.cmpi sle, %6, %21 : vector<1x256xi32>
    %c14_i32_5 = arith.constant 14 : i32
    %23 = vector.broadcast %c14_i32_5 : i32 to vector<1x256xi32>
    %24 = arith.cmpi sle, %4, %23 : vector<1x256xi32>
    %c1_i32_6 = arith.constant 1 : i32
    %25 = vector.broadcast %c1_i32_6 : i32 to vector<1x256xi32>
    %26 = arith.cmpi sge, %6, %25 : vector<1x256xi32>
    %27 = arith.andi %24, %26 : vector<1x256xi1>
    %c14_i32_7 = arith.constant 14 : i32
    %28 = vector.broadcast %c14_i32_7 : i32 to vector<1x256xi32>
    %29 = arith.cmpi sle, %4, %28 : vector<1x256xi32>
    %c14_i32_8 = arith.constant 14 : i32
    %30 = vector.broadcast %c14_i32_8 : i32 to vector<1x256xi32>
    %31 = arith.cmpi sle, %4, %30 : vector<1x256xi32>
    %c14_i32_9 = arith.constant 14 : i32
    %32 = vector.broadcast %c14_i32_9 : i32 to vector<1x256xi32>
    %33 = arith.cmpi sle, %6, %32 : vector<1x256xi32>
    %34 = arith.andi %31, %33 : vector<1x256xi1>
    %35 = tpu.iota {dimensions = array<i32: 1>} : vector<1x64xi32>
    %c63_i32 = arith.constant 63 : i32
    %36 = vector.broadcast %c63_i32 : i32 to vector<1x64xi32>
    %37 = arith.andi %35, %36 : vector<1x64xi32>
    %c3_i32 = arith.constant 3 : i32
    %38 = vector.broadcast %c3_i32 : i32 to vector<1x64xi32>
    %39 = arith.shrsi %37, %38 : vector<1x64xi32>
    %c7_i32 = arith.constant 7 : i32
    %40 = vector.broadcast %c7_i32 : i32 to vector<1x64xi32>
    %41 = arith.andi %37, %40 : vector<1x64xi32>
    %c1_i32_10 = arith.constant 1 : i32
    %42 = vector.broadcast %c1_i32_10 : i32 to vector<1x64xi32>
    %43 = arith.cmpi sge, %39, %42 : vector<1x64xi32>
    %c1_i32_11 = arith.constant 1 : i32
    %44 = vector.broadcast %c1_i32_11 : i32 to vector<1x64xi32>
    %45 = arith.cmpi sge, %41, %44 : vector<1x64xi32>
    %46 = arith.andi %43, %45 : vector<1x64xi1>
    %c1_i32_12 = arith.constant 1 : i32
    %47 = vector.broadcast %c1_i32_12 : i32 to vector<1x64xi32>
    %48 = arith.cmpi sge, %39, %47 : vector<1x64xi32>
    %c1_i32_13 = arith.constant 1 : i32
    %49 = vector.broadcast %c1_i32_13 : i32 to vector<1x64xi32>
    %50 = arith.cmpi sge, %39, %49 : vector<1x64xi32>
    %c6_i32 = arith.constant 6 : i32
    %51 = vector.broadcast %c6_i32 : i32 to vector<1x64xi32>
    %52 = arith.cmpi sle, %41, %51 : vector<1x64xi32>
    %53 = arith.andi %50, %52 : vector<1x64xi1>
    %c1_i32_14 = arith.constant 1 : i32
    %54 = vector.broadcast %c1_i32_14 : i32 to vector<1x64xi32>
    %55 = arith.cmpi sge, %41, %54 : vector<1x64xi32>
    %c6_i32_15 = arith.constant 6 : i32
    %56 = vector.broadcast %c6_i32_15 : i32 to vector<1x64xi32>
    %57 = arith.cmpi sle, %41, %56 : vector<1x64xi32>
    %c6_i32_16 = arith.constant 6 : i32
    %58 = vector.broadcast %c6_i32_16 : i32 to vector<1x64xi32>
    %59 = arith.cmpi sle, %39, %58 : vector<1x64xi32>
    %c1_i32_17 = arith.constant 1 : i32
    %60 = vector.broadcast %c1_i32_17 : i32 to vector<1x64xi32>
    %61 = arith.cmpi sge, %41, %60 : vector<1x64xi32>
    %62 = arith.andi %59, %61 : vector<1x64xi1>
    %c6_i32_18 = arith.constant 6 : i32
    %63 = vector.broadcast %c6_i32_18 : i32 to vector<1x64xi32>
    %64 = arith.cmpi sle, %39, %63 : vector<1x64xi32>
    %c6_i32_19 = arith.constant 6 : i32
    %65 = vector.broadcast %c6_i32_19 : i32 to vector<1x64xi32>
    %66 = arith.cmpi sle, %39, %65 : vector<1x64xi32>
    %c6_i32_20 = arith.constant 6 : i32
    %67 = vector.broadcast %c6_i32_20 : i32 to vector<1x64xi32>
    %68 = arith.cmpi sle, %41, %67 : vector<1x64xi32>
    %69 = arith.andi %66, %68 : vector<1x64xi1>
    %70 = tpu.iota {dimensions = array<i32: 1>} : vector<1x16xi32>
    %c15_i32_21 = arith.constant 15 : i32
    %71 = vector.broadcast %c15_i32_21 : i32 to vector<1x16xi32>
    %72 = arith.andi %70, %71 : vector<1x16xi32>
    %c2_i32 = arith.constant 2 : i32
    %73 = vector.broadcast %c2_i32 : i32 to vector<1x16xi32>
    %74 = arith.shrsi %72, %73 : vector<1x16xi32>
    %c3_i32_22 = arith.constant 3 : i32
    %75 = vector.broadcast %c3_i32_22 : i32 to vector<1x16xi32>
    %76 = arith.andi %72, %75 : vector<1x16xi32>
    %c1_i32_23 = arith.constant 1 : i32
    %77 = vector.broadcast %c1_i32_23 : i32 to vector<1x16xi32>
    %78 = arith.cmpi sge, %74, %77 : vector<1x16xi32>
    %c1_i32_24 = arith.constant 1 : i32
    %79 = vector.broadcast %c1_i32_24 : i32 to vector<1x16xi32>
    %80 = arith.cmpi sge, %76, %79 : vector<1x16xi32>
    %81 = arith.andi %78, %80 : vector<1x16xi1>
    %c1_i32_25 = arith.constant 1 : i32
    %82 = vector.broadcast %c1_i32_25 : i32 to vector<1x16xi32>
    %83 = arith.cmpi sge, %74, %82 : vector<1x16xi32>
    %c1_i32_26 = arith.constant 1 : i32
    %84 = vector.broadcast %c1_i32_26 : i32 to vector<1x16xi32>
    %85 = arith.cmpi sge, %74, %84 : vector<1x16xi32>
    %c2_i32_27 = arith.constant 2 : i32
    %86 = vector.broadcast %c2_i32_27 : i32 to vector<1x16xi32>
    %87 = arith.cmpi sle, %76, %86 : vector<1x16xi32>
    %88 = arith.andi %85, %87 : vector<1x16xi1>
    %c1_i32_28 = arith.constant 1 : i32
    %89 = vector.broadcast %c1_i32_28 : i32 to vector<1x16xi32>
    %90 = arith.cmpi sge, %76, %89 : vector<1x16xi32>
    %c2_i32_29 = arith.constant 2 : i32
    %91 = vector.broadcast %c2_i32_29 : i32 to vector<1x16xi32>
    %92 = arith.cmpi sle, %76, %91 : vector<1x16xi32>
    %c2_i32_30 = arith.constant 2 : i32
    %93 = vector.broadcast %c2_i32_30 : i32 to vector<1x16xi32>
    %94 = arith.cmpi sle, %74, %93 : vector<1x16xi32>
    %c1_i32_31 = arith.constant 1 : i32
    %95 = vector.broadcast %c1_i32_31 : i32 to vector<1x16xi32>
    %96 = arith.cmpi sge, %76, %95 : vector<1x16xi32>
    %97 = arith.andi %94, %96 : vector<1x16xi1>
    %c2_i32_32 = arith.constant 2 : i32
    %98 = vector.broadcast %c2_i32_32 : i32 to vector<1x16xi32>
    %99 = arith.cmpi sle, %74, %98 : vector<1x16xi32>
    %c2_i32_33 = arith.constant 2 : i32
    %100 = vector.broadcast %c2_i32_33 : i32 to vector<1x16xi32>
    %101 = arith.cmpi sle, %74, %100 : vector<1x16xi32>
    %c2_i32_34 = arith.constant 2 : i32
    %102 = vector.broadcast %c2_i32_34 : i32 to vector<1x16xi32>
    %103 = arith.cmpi sle, %76, %102 : vector<1x16xi32>
    %104 = arith.andi %101, %103 : vector<1x16xi1>
    %c0 = arith.constant 0 : index
    %c0_35 = arith.constant 0 : index
    %105 = vector.load %arg1[%c0, %c0_35] : memref<8x256xf32, #tpu.memory_space<vmem>>, vector<8x256xf32>
    %c17_i32 = arith.constant 17 : i32
    %106 = tpu.dynamic_rotate %105 by %c17_i32 dim 1 : vector<8x256xf32>, i32 -> vector<8x256xf32>
    %cst = arith.constant 0.000000e+00 : f32
    %107 = vector.shape_cast %11 : vector<1x256xi1> to vector<1x256xi1>
    %108 = vector.broadcast %107 : vector<1x256xi1> to vector<8x256xi1>
    %109 = vector.broadcast %cst : f32 to vector<8x256xf32>
    %110 = arith.select %108, %106, %109 : vector<8x256xi1>, vector<8x256xf32>
    %c16_i32 = arith.constant 16 : i32
    %111 = tpu.dynamic_rotate %105 by %c16_i32 dim 1 : vector<8x256xf32>, i32 -> vector<8x256xf32>
    %cst_36 = arith.constant 0.000000e+00 : f32
    %112 = vector.shape_cast %13 : vector<1x256xi1> to vector<1x256xi1>
    %113 = vector.broadcast %112 : vector<1x256xi1> to vector<8x256xi1>
    %114 = vector.broadcast %cst_36 : f32 to vector<8x256xf32>
    %115 = arith.select %113, %111, %114 : vector<8x256xi1>, vector<8x256xf32>
    %c15_i32_37 = arith.constant 15 : i32
    %116 = tpu.dynamic_rotate %105 by %c15_i32_37 dim 1 : vector<8x256xf32>, i32 -> vector<8x256xf32>
    %cst_38 = arith.constant 0.000000e+00 : f32
    %117 = vector.shape_cast %18 : vector<1x256xi1> to vector<1x256xi1>
    %118 = vector.broadcast %117 : vector<1x256xi1> to vector<8x256xi1>
    %119 = vector.broadcast %cst_38 : f32 to vector<8x256xf32>
    %120 = arith.select %118, %116, %119 : vector<8x256xi1>, vector<8x256xf32>
    %c1_i32_39 = arith.constant 1 : i32
    %121 = tpu.dynamic_rotate %105 by %c1_i32_39 dim 1 : vector<8x256xf32>, i32 -> vector<8x256xf32>
    %cst_40 = arith.constant 0.000000e+00 : f32
    %122 = vector.shape_cast %20 : vector<1x256xi1> to vector<1x256xi1>
    %123 = vector.broadcast %122 : vector<1x256xi1> to vector<8x256xi1>
    %124 = vector.broadcast %cst_40 : f32 to vector<8x256xf32>
    %125 = arith.select %123, %121, %124 : vector<8x256xi1>, vector<8x256xf32>
    %c255_i32_41 = arith.constant 255 : i32
    %126 = tpu.dynamic_rotate %105 by %c255_i32_41 dim 1 : vector<8x256xf32>, i32 -> vector<8x256xf32>
    %cst_42 = arith.constant 0.000000e+00 : f32
    %127 = vector.shape_cast %22 : vector<1x256xi1> to vector<1x256xi1>
    %128 = vector.broadcast %127 : vector<1x256xi1> to vector<8x256xi1>
    %129 = vector.broadcast %cst_42 : f32 to vector<8x256xf32>
    %130 = arith.select %128, %126, %129 : vector<8x256xi1>, vector<8x256xf32>
    %c241_i32 = arith.constant 241 : i32
    %131 = tpu.dynamic_rotate %105 by %c241_i32 dim 1 : vector<8x256xf32>, i32 -> vector<8x256xf32>
    %cst_43 = arith.constant 0.000000e+00 : f32
    %132 = vector.shape_cast %27 : vector<1x256xi1> to vector<1x256xi1>
    %133 = vector.broadcast %132 : vector<1x256xi1> to vector<8x256xi1>
    %134 = vector.broadcast %cst_43 : f32 to vector<8x256xf32>
    %135 = arith.select %133, %131, %134 : vector<8x256xi1>, vector<8x256xf32>
    %c240_i32 = arith.constant 240 : i32
    %136 = tpu.dynamic_rotate %105 by %c240_i32 dim 1 : vector<8x256xf32>, i32 -> vector<8x256xf32>
    %cst_44 = arith.constant 0.000000e+00 : f32
    %137 = vector.shape_cast %29 : vector<1x256xi1> to vector<1x256xi1>
    %138 = vector.broadcast %137 : vector<1x256xi1> to vector<8x256xi1>
    %139 = vector.broadcast %cst_44 : f32 to vector<8x256xf32>
    %140 = arith.select %138, %136, %139 : vector<8x256xi1>, vector<8x256xf32>
    %c239_i32 = arith.constant 239 : i32
    %141 = tpu.dynamic_rotate %105 by %c239_i32 dim 1 : vector<8x256xf32>, i32 -> vector<8x256xf32>
    %cst_45 = arith.constant 0.000000e+00 : f32
    %142 = vector.shape_cast %34 : vector<1x256xi1> to vector<1x256xi1>
    %143 = vector.broadcast %142 : vector<1x256xi1> to vector<8x256xi1>
    %144 = vector.broadcast %cst_45 : f32 to vector<8x256xf32>
    %145 = arith.select %143, %141, %144 : vector<8x256xi1>, vector<8x256xf32>
    %146 = tpu.concatenate %110, %115, %120, %125, %105, %130, %135, %140, %145 in 0 : vector<8x256xf32>, vector<8x256xf32>, vector<8x256xf32>, vector<8x256xf32>, vector<8x256xf32>, vector<8x256xf32>, vector<8x256xf32>, vector<8x256xf32>, vector<8x256xf32> -> vector<72x256xf32>
    %c0_46 = arith.constant 0 : index
    %c0_47 = arith.constant 0 : index
    %c0_48 = arith.constant 0 : index
    %147 = vector.load %arg2[%c0_46, %c0_47, %c0_48] : memref<7x8x72xf32, #tpu.memory_space<vmem>>, vector<1x8x72xf32>
    %148 = vector.shape_cast %147 : vector<1x8x72xf32> to vector<8x72xf32>
    %cst_49 = arith.constant dense<0.000000e+00> : vector<8x256xf32>
    %149 = tpu.matmul %148, %146, %cst_49 {dimension_numbers = #tpu.dot_dimension_numbers<[1], [0], [0], [1], [0, 0, 1, 1], [], []>} : vector<8x72xf32>, vector<72x256xf32>, vector<8x256xf32> -> vector<8x256xf32>
    %c0_50 = arith.constant 0 : index
    %c0_51 = arith.constant 0 : index
    %c0_52 = arith.constant 0 : index
    %150 = vector.load %arg3[%c0_50, %c0_51, %c0_52] : memref<7x8x1xf32, #tpu.memory_space<vmem>>, vector<1x8x1xf32>
    %151 = vector.shape_cast %150 : vector<1x8x1xf32> to vector<8x1xf32>
    %152 = vector.broadcast %151 : vector<8x1xf32> to vector<8x256xf32>
    %153 = arith.addf %149, %152 : vector<8x256xf32>
    %cst_53 = arith.constant 0.000000e+00 : f32
    %154 = vector.broadcast %cst_53 : f32 to vector<8x256xf32>
    %155 = arith.maximumf %153, %154 : vector<8x256xf32>
    %c0_54 = arith.constant 0 : index
    %c0_55 = arith.constant 0 : index
    %156 = vector.load %arg4[%c0_54, %c0_55] : memref<256x64xf32, #tpu.memory_space<vmem>>, vector<256x64xf32>
    %cst_56 = arith.constant dense<0.000000e+00> : vector<8x64xf32>
    %157 = tpu.matmul %105, %156, %cst_56 {dimension_numbers = #tpu.dot_dimension_numbers<[1], [0], [0], [1], [0, 0, 1, 1], [], []>} : vector<8x256xf32>, vector<256x64xf32>, vector<8x64xf32> -> vector<8x64xf32>
    %c9_i32 = arith.constant 9 : i32
    %158 = tpu.dynamic_rotate %157 by %c9_i32 dim 1 : vector<8x64xf32>, i32 -> vector<8x64xf32>
    %cst_57 = arith.constant 0.000000e+00 : f32
    %159 = vector.shape_cast %46 : vector<1x64xi1> to vector<1x64xi1>
    %160 = vector.broadcast %159 : vector<1x64xi1> to vector<8x64xi1>
    %161 = vector.broadcast %cst_57 : f32 to vector<8x64xf32>
    %162 = arith.select %160, %158, %161 : vector<8x64xi1>, vector<8x64xf32>
    %c8_i32 = arith.constant 8 : i32
    %163 = tpu.dynamic_rotate %157 by %c8_i32 dim 1 : vector<8x64xf32>, i32 -> vector<8x64xf32>
    %cst_58 = arith.constant 0.000000e+00 : f32
    %164 = vector.shape_cast %48 : vector<1x64xi1> to vector<1x64xi1>
    %165 = vector.broadcast %164 : vector<1x64xi1> to vector<8x64xi1>
    %166 = vector.broadcast %cst_58 : f32 to vector<8x64xf32>
    %167 = arith.select %165, %163, %166 : vector<8x64xi1>, vector<8x64xf32>
    %c7_i32_59 = arith.constant 7 : i32
    %168 = tpu.dynamic_rotate %157 by %c7_i32_59 dim 1 : vector<8x64xf32>, i32 -> vector<8x64xf32>
    %cst_60 = arith.constant 0.000000e+00 : f32
    %169 = vector.shape_cast %53 : vector<1x64xi1> to vector<1x64xi1>
    %170 = vector.broadcast %169 : vector<1x64xi1> to vector<8x64xi1>
    %171 = vector.broadcast %cst_60 : f32 to vector<8x64xf32>
    %172 = arith.select %170, %168, %171 : vector<8x64xi1>, vector<8x64xf32>
    %c1_i32_61 = arith.constant 1 : i32
    %173 = tpu.dynamic_rotate %157 by %c1_i32_61 dim 1 : vector<8x64xf32>, i32 -> vector<8x64xf32>
    %cst_62 = arith.constant 0.000000e+00 : f32
    %174 = vector.shape_cast %55 : vector<1x64xi1> to vector<1x64xi1>
    %175 = vector.broadcast %174 : vector<1x64xi1> to vector<8x64xi1>
    %176 = vector.broadcast %cst_62 : f32 to vector<8x64xf32>
    %177 = arith.select %175, %173, %176 : vector<8x64xi1>, vector<8x64xf32>
    %c63_i32_63 = arith.constant 63 : i32
    %178 = tpu.dynamic_rotate %157 by %c63_i32_63 dim 1 : vector<8x64xf32>, i32 -> vector<8x64xf32>
    %cst_64 = arith.constant 0.000000e+00 : f32
    %179 = vector.shape_cast %57 : vector<1x64xi1> to vector<1x64xi1>
    %180 = vector.broadcast %179 : vector<1x64xi1> to vector<8x64xi1>
    %181 = vector.broadcast %cst_64 : f32 to vector<8x64xf32>
    %182 = arith.select %180, %178, %181 : vector<8x64xi1>, vector<8x64xf32>
    %c57_i32 = arith.constant 57 : i32
    %183 = tpu.dynamic_rotate %157 by %c57_i32 dim 1 : vector<8x64xf32>, i32 -> vector<8x64xf32>
    %cst_65 = arith.constant 0.000000e+00 : f32
    %184 = vector.shape_cast %62 : vector<1x64xi1> to vector<1x64xi1>
    %185 = vector.broadcast %184 : vector<1x64xi1> to vector<8x64xi1>
    %186 = vector.broadcast %cst_65 : f32 to vector<8x64xf32>
    %187 = arith.select %185, %183, %186 : vector<8x64xi1>, vector<8x64xf32>
    %c56_i32 = arith.constant 56 : i32
    %188 = tpu.dynamic_rotate %157 by %c56_i32 dim 1 : vector<8x64xf32>, i32 -> vector<8x64xf32>
    %cst_66 = arith.constant 0.000000e+00 : f32
    %189 = vector.shape_cast %64 : vector<1x64xi1> to vector<1x64xi1>
    %190 = vector.broadcast %189 : vector<1x64xi1> to vector<8x64xi1>
    %191 = vector.broadcast %cst_66 : f32 to vector<8x64xf32>
    %192 = arith.select %190, %188, %191 : vector<8x64xi1>, vector<8x64xf32>
    %c55_i32 = arith.constant 55 : i32
    %193 = tpu.dynamic_rotate %157 by %c55_i32 dim 1 : vector<8x64xf32>, i32 -> vector<8x64xf32>
    %cst_67 = arith.constant 0.000000e+00 : f32
    %194 = vector.shape_cast %69 : vector<1x64xi1> to vector<1x64xi1>
    %195 = vector.broadcast %194 : vector<1x64xi1> to vector<8x64xi1>
    %196 = vector.broadcast %cst_67 : f32 to vector<8x64xf32>
    %197 = arith.select %195, %193, %196 : vector<8x64xi1>, vector<8x64xf32>
    %198 = tpu.concatenate %162, %167, %172, %177, %157, %182, %187, %192, %197 in 0 : vector<8x64xf32>, vector<8x64xf32>, vector<8x64xf32>, vector<8x64xf32>, vector<8x64xf32>, vector<8x64xf32>, vector<8x64xf32>, vector<8x64xf32>, vector<8x64xf32> -> vector<72x64xf32>
    %c1 = arith.constant 1 : index
    %c0_68 = arith.constant 0 : index
    %c0_69 = arith.constant 0 : index
    %199 = vector.load %arg2[%c1, %c0_68, %c0_69] : memref<7x8x72xf32, #tpu.memory_space<vmem>>, vector<1x8x72xf32>
    %200 = vector.shape_cast %199 : vector<1x8x72xf32> to vector<8x72xf32>
    %cst_70 = arith.constant dense<0.000000e+00> : vector<8x64xf32>
    %201 = tpu.matmul %200, %198, %cst_70 {dimension_numbers = #tpu.dot_dimension_numbers<[1], [0], [0], [1], [0, 0, 1, 1], [], []>} : vector<8x72xf32>, vector<72x64xf32>, vector<8x64xf32> -> vector<8x64xf32>
    %c1_71 = arith.constant 1 : index
    %c0_72 = arith.constant 0 : index
    %c0_73 = arith.constant 0 : index
    %202 = vector.load %arg3[%c1_71, %c0_72, %c0_73] : memref<7x8x1xf32, #tpu.memory_space<vmem>>, vector<1x8x1xf32>
    %203 = vector.shape_cast %202 : vector<1x8x1xf32> to vector<8x1xf32>
    %204 = vector.broadcast %203 : vector<8x1xf32> to vector<8x64xf32>
    %205 = arith.addf %201, %204 : vector<8x64xf32>
    %cst_74 = arith.constant 0.000000e+00 : f32
    %206 = vector.broadcast %cst_74 : f32 to vector<8x64xf32>
    %207 = arith.maximumf %205, %206 : vector<8x64xf32>
    %c9_i32_75 = arith.constant 9 : i32
    %208 = tpu.dynamic_rotate %207 by %c9_i32_75 dim 1 : vector<8x64xf32>, i32 -> vector<8x64xf32>
    %cst_76 = arith.constant 0.000000e+00 : f32
    %209 = vector.shape_cast %46 : vector<1x64xi1> to vector<1x64xi1>
    %210 = vector.broadcast %209 : vector<1x64xi1> to vector<8x64xi1>
    %211 = vector.broadcast %cst_76 : f32 to vector<8x64xf32>
    %212 = arith.select %210, %208, %211 : vector<8x64xi1>, vector<8x64xf32>
    %c8_i32_77 = arith.constant 8 : i32
    %213 = tpu.dynamic_rotate %207 by %c8_i32_77 dim 1 : vector<8x64xf32>, i32 -> vector<8x64xf32>
    %cst_78 = arith.constant 0.000000e+00 : f32
    %214 = vector.shape_cast %48 : vector<1x64xi1> to vector<1x64xi1>
    %215 = vector.broadcast %214 : vector<1x64xi1> to vector<8x64xi1>
    %216 = vector.broadcast %cst_78 : f32 to vector<8x64xf32>
    %217 = arith.select %215, %213, %216 : vector<8x64xi1>, vector<8x64xf32>
    %c7_i32_79 = arith.constant 7 : i32
    %218 = tpu.dynamic_rotate %207 by %c7_i32_79 dim 1 : vector<8x64xf32>, i32 -> vector<8x64xf32>
    %cst_80 = arith.constant 0.000000e+00 : f32
    %219 = vector.shape_cast %53 : vector<1x64xi1> to vector<1x64xi1>
    %220 = vector.broadcast %219 : vector<1x64xi1> to vector<8x64xi1>
    %221 = vector.broadcast %cst_80 : f32 to vector<8x64xf32>
    %222 = arith.select %220, %218, %221 : vector<8x64xi1>, vector<8x64xf32>
    %c1_i32_81 = arith.constant 1 : i32
    %223 = tpu.dynamic_rotate %207 by %c1_i32_81 dim 1 : vector<8x64xf32>, i32 -> vector<8x64xf32>
    %cst_82 = arith.constant 0.000000e+00 : f32
    %224 = vector.shape_cast %55 : vector<1x64xi1> to vector<1x64xi1>
    %225 = vector.broadcast %224 : vector<1x64xi1> to vector<8x64xi1>
    %226 = vector.broadcast %cst_82 : f32 to vector<8x64xf32>
    %227 = arith.select %225, %223, %226 : vector<8x64xi1>, vector<8x64xf32>
    %c63_i32_83 = arith.constant 63 : i32
    %228 = tpu.dynamic_rotate %207 by %c63_i32_83 dim 1 : vector<8x64xf32>, i32 -> vector<8x64xf32>
    %cst_84 = arith.constant 0.000000e+00 : f32
    %229 = vector.shape_cast %57 : vector<1x64xi1> to vector<1x64xi1>
    %230 = vector.broadcast %229 : vector<1x64xi1> to vector<8x64xi1>
    %231 = vector.broadcast %cst_84 : f32 to vector<8x64xf32>
    %232 = arith.select %230, %228, %231 : vector<8x64xi1>, vector<8x64xf32>
    %c57_i32_85 = arith.constant 57 : i32
    %233 = tpu.dynamic_rotate %207 by %c57_i32_85 dim 1 : vector<8x64xf32>, i32 -> vector<8x64xf32>
    %cst_86 = arith.constant 0.000000e+00 : f32
    %234 = vector.shape_cast %62 : vector<1x64xi1> to vector<1x64xi1>
    %235 = vector.broadcast %234 : vector<1x64xi1> to vector<8x64xi1>
    %236 = vector.broadcast %cst_86 : f32 to vector<8x64xf32>
    %237 = arith.select %235, %233, %236 : vector<8x64xi1>, vector<8x64xf32>
    %c56_i32_87 = arith.constant 56 : i32
    %238 = tpu.dynamic_rotate %207 by %c56_i32_87 dim 1 : vector<8x64xf32>, i32 -> vector<8x64xf32>
    %cst_88 = arith.constant 0.000000e+00 : f32
    %239 = vector.shape_cast %64 : vector<1x64xi1> to vector<1x64xi1>
    %240 = vector.broadcast %239 : vector<1x64xi1> to vector<8x64xi1>
    %241 = vector.broadcast %cst_88 : f32 to vector<8x64xf32>
    %242 = arith.select %240, %238, %241 : vector<8x64xi1>, vector<8x64xf32>
    %c55_i32_89 = arith.constant 55 : i32
    %243 = tpu.dynamic_rotate %207 by %c55_i32_89 dim 1 : vector<8x64xf32>, i32 -> vector<8x64xf32>
    %cst_90 = arith.constant 0.000000e+00 : f32
    %244 = vector.shape_cast %69 : vector<1x64xi1> to vector<1x64xi1>
    %245 = vector.broadcast %244 : vector<1x64xi1> to vector<8x64xi1>
    %246 = vector.broadcast %cst_90 : f32 to vector<8x64xf32>
    %247 = arith.select %245, %243, %246 : vector<8x64xi1>, vector<8x64xf32>
    %248 = tpu.concatenate %212, %217, %222, %227, %207, %232, %237, %242, %247 in 0 : vector<8x64xf32>, vector<8x64xf32>, vector<8x64xf32>, vector<8x64xf32>, vector<8x64xf32>, vector<8x64xf32>, vector<8x64xf32>, vector<8x64xf32>, vector<8x64xf32> -> vector<72x64xf32>
    %c2 = arith.constant 2 : index
    %c0_91 = arith.constant 0 : index
    %c0_92 = arith.constant 0 : index
    %249 = vector.load %arg2[%c2, %c0_91, %c0_92] : memref<7x8x72xf32, #tpu.memory_space<vmem>>, vector<1x8x72xf32>
    %250 = vector.shape_cast %249 : vector<1x8x72xf32> to vector<8x72xf32>
    %cst_93 = arith.constant dense<0.000000e+00> : vector<8x64xf32>
    %251 = tpu.matmul %250, %248, %cst_93 {dimension_numbers = #tpu.dot_dimension_numbers<[1], [0], [0], [1], [0, 0, 1, 1], [], []>} : vector<8x72xf32>, vector<72x64xf32>, vector<8x64xf32> -> vector<8x64xf32>
    %c2_94 = arith.constant 2 : index
    %c0_95 = arith.constant 0 : index
    %c0_96 = arith.constant 0 : index
    %252 = vector.load %arg3[%c2_94, %c0_95, %c0_96] : memref<7x8x1xf32, #tpu.memory_space<vmem>>, vector<1x8x1xf32>
    %253 = vector.shape_cast %252 : vector<1x8x1xf32> to vector<8x1xf32>
    %254 = vector.broadcast %253 : vector<8x1xf32> to vector<8x64xf32>
    %255 = arith.addf %251, %254 : vector<8x64xf32>
    %cst_97 = arith.constant 0.000000e+00 : f32
    %256 = vector.broadcast %cst_97 : f32 to vector<8x64xf32>
    %257 = arith.maximumf %255, %256 : vector<8x64xf32>
    %c0_98 = arith.constant 0 : index
    %c0_99 = arith.constant 0 : index
    %258 = vector.load %arg6[%c0_98, %c0_99] : memref<64x16xf32, #tpu.memory_space<vmem>>, vector<64x16xf32>
    %cst_100 = arith.constant dense<0.000000e+00> : vector<8x16xf32>
    %259 = tpu.matmul %207, %258, %cst_100 {dimension_numbers = #tpu.dot_dimension_numbers<[1], [0], [0], [1], [0, 0, 1, 1], [], []>} : vector<8x64xf32>, vector<64x16xf32>, vector<8x16xf32> -> vector<8x16xf32>
    %c5_i32 = arith.constant 5 : i32
    %260 = tpu.dynamic_rotate %259 by %c5_i32 dim 1 : vector<8x16xf32>, i32 -> vector<8x16xf32>
    %cst_101 = arith.constant 0.000000e+00 : f32
    %261 = vector.shape_cast %81 : vector<1x16xi1> to vector<1x16xi1>
    %262 = vector.broadcast %261 : vector<1x16xi1> to vector<8x16xi1>
    %263 = vector.broadcast %cst_101 : f32 to vector<8x16xf32>
    %264 = arith.select %262, %260, %263 : vector<8x16xi1>, vector<8x16xf32>
    %c4_i32_102 = arith.constant 4 : i32
    %265 = tpu.dynamic_rotate %259 by %c4_i32_102 dim 1 : vector<8x16xf32>, i32 -> vector<8x16xf32>
    %cst_103 = arith.constant 0.000000e+00 : f32
    %266 = vector.shape_cast %83 : vector<1x16xi1> to vector<1x16xi1>
    %267 = vector.broadcast %266 : vector<1x16xi1> to vector<8x16xi1>
    %268 = vector.broadcast %cst_103 : f32 to vector<8x16xf32>
    %269 = arith.select %267, %265, %268 : vector<8x16xi1>, vector<8x16xf32>
    %c3_i32_104 = arith.constant 3 : i32
    %270 = tpu.dynamic_rotate %259 by %c3_i32_104 dim 1 : vector<8x16xf32>, i32 -> vector<8x16xf32>
    %cst_105 = arith.constant 0.000000e+00 : f32
    %271 = vector.shape_cast %88 : vector<1x16xi1> to vector<1x16xi1>
    %272 = vector.broadcast %271 : vector<1x16xi1> to vector<8x16xi1>
    %273 = vector.broadcast %cst_105 : f32 to vector<8x16xf32>
    %274 = arith.select %272, %270, %273 : vector<8x16xi1>, vector<8x16xf32>
    %c1_i32_106 = arith.constant 1 : i32
    %275 = tpu.dynamic_rotate %259 by %c1_i32_106 dim 1 : vector<8x16xf32>, i32 -> vector<8x16xf32>
    %cst_107 = arith.constant 0.000000e+00 : f32
    %276 = vector.shape_cast %90 : vector<1x16xi1> to vector<1x16xi1>
    %277 = vector.broadcast %276 : vector<1x16xi1> to vector<8x16xi1>
    %278 = vector.broadcast %cst_107 : f32 to vector<8x16xf32>
    %279 = arith.select %277, %275, %278 : vector<8x16xi1>, vector<8x16xf32>
    %c15_i32_108 = arith.constant 15 : i32
    %280 = tpu.dynamic_rotate %259 by %c15_i32_108 dim 1 : vector<8x16xf32>, i32 -> vector<8x16xf32>
    %cst_109 = arith.constant 0.000000e+00 : f32
    %281 = vector.shape_cast %92 : vector<1x16xi1> to vector<1x16xi1>
    %282 = vector.broadcast %281 : vector<1x16xi1> to vector<8x16xi1>
    %283 = vector.broadcast %cst_109 : f32 to vector<8x16xf32>
    %284 = arith.select %282, %280, %283 : vector<8x16xi1>, vector<8x16xf32>
    %c13_i32 = arith.constant 13 : i32
    %285 = tpu.dynamic_rotate %259 by %c13_i32 dim 1 : vector<8x16xf32>, i32 -> vector<8x16xf32>
    %cst_110 = arith.constant 0.000000e+00 : f32
    %286 = vector.shape_cast %97 : vector<1x16xi1> to vector<1x16xi1>
    %287 = vector.broadcast %286 : vector<1x16xi1> to vector<8x16xi1>
    %288 = vector.broadcast %cst_110 : f32 to vector<8x16xf32>
    %289 = arith.select %287, %285, %288 : vector<8x16xi1>, vector<8x16xf32>
    %c12_i32 = arith.constant 12 : i32
    %290 = tpu.dynamic_rotate %259 by %c12_i32 dim 1 : vector<8x16xf32>, i32 -> vector<8x16xf32>
    %cst_111 = arith.constant 0.000000e+00 : f32
    %291 = vector.shape_cast %99 : vector<1x16xi1> to vector<1x16xi1>
    %292 = vector.broadcast %291 : vector<1x16xi1> to vector<8x16xi1>
    %293 = vector.broadcast %cst_111 : f32 to vector<8x16xf32>
    %294 = arith.select %292, %290, %293 : vector<8x16xi1>, vector<8x16xf32>
    %c11_i32 = arith.constant 11 : i32
    %295 = tpu.dynamic_rotate %259 by %c11_i32 dim 1 : vector<8x16xf32>, i32 -> vector<8x16xf32>
    %cst_112 = arith.constant 0.000000e+00 : f32
    %296 = vector.shape_cast %104 : vector<1x16xi1> to vector<1x16xi1>
    %297 = vector.broadcast %296 : vector<1x16xi1> to vector<8x16xi1>
    %298 = vector.broadcast %cst_112 : f32 to vector<8x16xf32>
    %299 = arith.select %297, %295, %298 : vector<8x16xi1>, vector<8x16xf32>
    %300 = tpu.concatenate %264, %269, %274, %279, %259, %284, %289, %294, %299 in 0 : vector<8x16xf32>, vector<8x16xf32>, vector<8x16xf32>, vector<8x16xf32>, vector<8x16xf32>, vector<8x16xf32>, vector<8x16xf32>, vector<8x16xf32>, vector<8x16xf32> -> vector<72x16xf32>
    %c3 = arith.constant 3 : index
    %c0_113 = arith.constant 0 : index
    %c0_114 = arith.constant 0 : index
    %301 = vector.load %arg2[%c3, %c0_113, %c0_114] : memref<7x8x72xf32, #tpu.memory_space<vmem>>, vector<1x8x72xf32>
    %302 = vector.shape_cast %301 : vector<1x8x72xf32> to vector<8x72xf32>
    %cst_115 = arith.constant dense<0.000000e+00> : vector<8x16xf32>
    %303 = tpu.matmul %302, %300, %cst_115 {dimension_numbers = #tpu.dot_dimension_numbers<[1], [0], [0], [1], [0, 0, 1, 1], [], []>} : vector<8x72xf32>, vector<72x16xf32>, vector<8x16xf32> -> vector<8x16xf32>
    %c3_116 = arith.constant 3 : index
    %c0_117 = arith.constant 0 : index
    %c0_118 = arith.constant 0 : index
    %304 = vector.load %arg3[%c3_116, %c0_117, %c0_118] : memref<7x8x1xf32, #tpu.memory_space<vmem>>, vector<1x8x1xf32>
    %305 = vector.shape_cast %304 : vector<1x8x1xf32> to vector<8x1xf32>
    %306 = vector.broadcast %305 : vector<8x1xf32> to vector<8x16xf32>
    %307 = arith.addf %303, %306 : vector<8x16xf32>
    %cst_119 = arith.constant 0.000000e+00 : f32
    %308 = vector.broadcast %cst_119 : f32 to vector<8x16xf32>
    %309 = arith.maximumf %307, %308 : vector<8x16xf32>
    %c5_i32_120 = arith.constant 5 : i32
    %310 = tpu.dynamic_rotate %309 by %c5_i32_120 dim 1 : vector<8x16xf32>, i32 -> vector<8x16xf32>
    %cst_121 = arith.constant 0.000000e+00 : f32
    %311 = vector.shape_cast %81 : vector<1x16xi1> to vector<1x16xi1>
    %312 = vector.broadcast %311 : vector<1x16xi1> to vector<8x16xi1>
    %313 = vector.broadcast %cst_121 : f32 to vector<8x16xf32>
    %314 = arith.select %312, %310, %313 : vector<8x16xi1>, vector<8x16xf32>
    %c4_i32_122 = arith.constant 4 : i32
    %315 = tpu.dynamic_rotate %309 by %c4_i32_122 dim 1 : vector<8x16xf32>, i32 -> vector<8x16xf32>
    %cst_123 = arith.constant 0.000000e+00 : f32
    %316 = vector.shape_cast %83 : vector<1x16xi1> to vector<1x16xi1>
    %317 = vector.broadcast %316 : vector<1x16xi1> to vector<8x16xi1>
    %318 = vector.broadcast %cst_123 : f32 to vector<8x16xf32>
    %319 = arith.select %317, %315, %318 : vector<8x16xi1>, vector<8x16xf32>
    %c3_i32_124 = arith.constant 3 : i32
    %320 = tpu.dynamic_rotate %309 by %c3_i32_124 dim 1 : vector<8x16xf32>, i32 -> vector<8x16xf32>
    %cst_125 = arith.constant 0.000000e+00 : f32
    %321 = vector.shape_cast %88 : vector<1x16xi1> to vector<1x16xi1>
    %322 = vector.broadcast %321 : vector<1x16xi1> to vector<8x16xi1>
    %323 = vector.broadcast %cst_125 : f32 to vector<8x16xf32>
    %324 = arith.select %322, %320, %323 : vector<8x16xi1>, vector<8x16xf32>
    %c1_i32_126 = arith.constant 1 : i32
    %325 = tpu.dynamic_rotate %309 by %c1_i32_126 dim 1 : vector<8x16xf32>, i32 -> vector<8x16xf32>
    %cst_127 = arith.constant 0.000000e+00 : f32
    %326 = vector.shape_cast %90 : vector<1x16xi1> to vector<1x16xi1>
    %327 = vector.broadcast %326 : vector<1x16xi1> to vector<8x16xi1>
    %328 = vector.broadcast %cst_127 : f32 to vector<8x16xf32>
    %329 = arith.select %327, %325, %328 : vector<8x16xi1>, vector<8x16xf32>
    %c15_i32_128 = arith.constant 15 : i32
    %330 = tpu.dynamic_rotate %309 by %c15_i32_128 dim 1 : vector<8x16xf32>, i32 -> vector<8x16xf32>
    %cst_129 = arith.constant 0.000000e+00 : f32
    %331 = vector.shape_cast %92 : vector<1x16xi1> to vector<1x16xi1>
    %332 = vector.broadcast %331 : vector<1x16xi1> to vector<8x16xi1>
    %333 = vector.broadcast %cst_129 : f32 to vector<8x16xf32>
    %334 = arith.select %332, %330, %333 : vector<8x16xi1>, vector<8x16xf32>
    %c13_i32_130 = arith.constant 13 : i32
    %335 = tpu.dynamic_rotate %309 by %c13_i32_130 dim 1 : vector<8x16xf32>, i32 -> vector<8x16xf32>
    %cst_131 = arith.constant 0.000000e+00 : f32
    %336 = vector.shape_cast %97 : vector<1x16xi1> to vector<1x16xi1>
    %337 = vector.broadcast %336 : vector<1x16xi1> to vector<8x16xi1>
    %338 = vector.broadcast %cst_131 : f32 to vector<8x16xf32>
    %339 = arith.select %337, %335, %338 : vector<8x16xi1>, vector<8x16xf32>
    %c12_i32_132 = arith.constant 12 : i32
    %340 = tpu.dynamic_rotate %309 by %c12_i32_132 dim 1 : vector<8x16xf32>, i32 -> vector<8x16xf32>
    %cst_133 = arith.constant 0.000000e+00 : f32
    %341 = vector.shape_cast %99 : vector<1x16xi1> to vector<1x16xi1>
    %342 = vector.broadcast %341 : vector<1x16xi1> to vector<8x16xi1>
    %343 = vector.broadcast %cst_133 : f32 to vector<8x16xf32>
    %344 = arith.select %342, %340, %343 : vector<8x16xi1>, vector<8x16xf32>
    %c11_i32_134 = arith.constant 11 : i32
    %345 = tpu.dynamic_rotate %309 by %c11_i32_134 dim 1 : vector<8x16xf32>, i32 -> vector<8x16xf32>
    %cst_135 = arith.constant 0.000000e+00 : f32
    %346 = vector.shape_cast %104 : vector<1x16xi1> to vector<1x16xi1>
    %347 = vector.broadcast %346 : vector<1x16xi1> to vector<8x16xi1>
    %348 = vector.broadcast %cst_135 : f32 to vector<8x16xf32>
    %349 = arith.select %347, %345, %348 : vector<8x16xi1>, vector<8x16xf32>
    %350 = tpu.concatenate %314, %319, %324, %329, %309, %334, %339, %344, %349 in 0 : vector<8x16xf32>, vector<8x16xf32>, vector<8x16xf32>, vector<8x16xf32>, vector<8x16xf32>, vector<8x16xf32>, vector<8x16xf32>, vector<8x16xf32>, vector<8x16xf32> -> vector<72x16xf32>
    %c4 = arith.constant 4 : index
    %c0_136 = arith.constant 0 : index
    %c0_137 = arith.constant 0 : index
    %351 = vector.load %arg2[%c4, %c0_136, %c0_137] : memref<7x8x72xf32, #tpu.memory_space<vmem>>, vector<1x8x72xf32>
    %352 = vector.shape_cast %351 : vector<1x8x72xf32> to vector<8x72xf32>
    %cst_138 = arith.constant dense<0.000000e+00> : vector<8x16xf32>
    %353 = tpu.matmul %352, %350, %cst_138 {dimension_numbers = #tpu.dot_dimension_numbers<[1], [0], [0], [1], [0, 0, 1, 1], [], []>} : vector<8x72xf32>, vector<72x16xf32>, vector<8x16xf32> -> vector<8x16xf32>
    %c4_139 = arith.constant 4 : index
    %c0_140 = arith.constant 0 : index
    %c0_141 = arith.constant 0 : index
    %354 = vector.load %arg3[%c4_139, %c0_140, %c0_141] : memref<7x8x1xf32, #tpu.memory_space<vmem>>, vector<1x8x1xf32>
    %355 = vector.shape_cast %354 : vector<1x8x1xf32> to vector<8x1xf32>
    %356 = vector.broadcast %355 : vector<8x1xf32> to vector<8x16xf32>
    %357 = arith.addf %353, %356 : vector<8x16xf32>
    %cst_142 = arith.constant 0.000000e+00 : f32
    %358 = vector.broadcast %cst_142 : f32 to vector<8x16xf32>
    %359 = arith.maximumf %357, %358 : vector<8x16xf32>
    %c5_i32_143 = arith.constant 5 : i32
    %360 = tpu.dynamic_rotate %359 by %c5_i32_143 dim 1 : vector<8x16xf32>, i32 -> vector<8x16xf32>
    %cst_144 = arith.constant 0.000000e+00 : f32
    %361 = vector.shape_cast %81 : vector<1x16xi1> to vector<1x16xi1>
    %362 = vector.broadcast %361 : vector<1x16xi1> to vector<8x16xi1>
    %363 = vector.broadcast %cst_144 : f32 to vector<8x16xf32>
    %364 = arith.select %362, %360, %363 : vector<8x16xi1>, vector<8x16xf32>
    %c4_i32_145 = arith.constant 4 : i32
    %365 = tpu.dynamic_rotate %359 by %c4_i32_145 dim 1 : vector<8x16xf32>, i32 -> vector<8x16xf32>
    %cst_146 = arith.constant 0.000000e+00 : f32
    %366 = vector.shape_cast %83 : vector<1x16xi1> to vector<1x16xi1>
    %367 = vector.broadcast %366 : vector<1x16xi1> to vector<8x16xi1>
    %368 = vector.broadcast %cst_146 : f32 to vector<8x16xf32>
    %369 = arith.select %367, %365, %368 : vector<8x16xi1>, vector<8x16xf32>
    %c3_i32_147 = arith.constant 3 : i32
    %370 = tpu.dynamic_rotate %359 by %c3_i32_147 dim 1 : vector<8x16xf32>, i32 -> vector<8x16xf32>
    %cst_148 = arith.constant 0.000000e+00 : f32
    %371 = vector.shape_cast %88 : vector<1x16xi1> to vector<1x16xi1>
    %372 = vector.broadcast %371 : vector<1x16xi1> to vector<8x16xi1>
    %373 = vector.broadcast %cst_148 : f32 to vector<8x16xf32>
    %374 = arith.select %372, %370, %373 : vector<8x16xi1>, vector<8x16xf32>
    %c1_i32_149 = arith.constant 1 : i32
    %375 = tpu.dynamic_rotate %359 by %c1_i32_149 dim 1 : vector<8x16xf32>, i32 -> vector<8x16xf32>
    %cst_150 = arith.constant 0.000000e+00 : f32
    %376 = vector.shape_cast %90 : vector<1x16xi1> to vector<1x16xi1>
    %377 = vector.broadcast %376 : vector<1x16xi1> to vector<8x16xi1>
    %378 = vector.broadcast %cst_150 : f32 to vector<8x16xf32>
    %379 = arith.select %377, %375, %378 : vector<8x16xi1>, vector<8x16xf32>
    %c15_i32_151 = arith.constant 15 : i32
    %380 = tpu.dynamic_rotate %359 by %c15_i32_151 dim 1 : vector<8x16xf32>, i32 -> vector<8x16xf32>
    %cst_152 = arith.constant 0.000000e+00 : f32
    %381 = vector.shape_cast %92 : vector<1x16xi1> to vector<1x16xi1>
    %382 = vector.broadcast %381 : vector<1x16xi1> to vector<8x16xi1>
    %383 = vector.broadcast %cst_152 : f32 to vector<8x16xf32>
    %384 = arith.select %382, %380, %383 : vector<8x16xi1>, vector<8x16xf32>
    %c13_i32_153 = arith.constant 13 : i32
    %385 = tpu.dynamic_rotate %359 by %c13_i32_153 dim 1 : vector<8x16xf32>, i32 -> vector<8x16xf32>
    %cst_154 = arith.constant 0.000000e+00 : f32
    %386 = vector.shape_cast %97 : vector<1x16xi1> to vector<1x16xi1>
    %387 = vector.broadcast %386 : vector<1x16xi1> to vector<8x16xi1>
    %388 = vector.broadcast %cst_154 : f32 to vector<8x16xf32>
    %389 = arith.select %387, %385, %388 : vector<8x16xi1>, vector<8x16xf32>
    %c12_i32_155 = arith.constant 12 : i32
    %390 = tpu.dynamic_rotate %359 by %c12_i32_155 dim 1 : vector<8x16xf32>, i32 -> vector<8x16xf32>
    %cst_156 = arith.constant 0.000000e+00 : f32
    %391 = vector.shape_cast %99 : vector<1x16xi1> to vector<1x16xi1>
    %392 = vector.broadcast %391 : vector<1x16xi1> to vector<8x16xi1>
    %393 = vector.broadcast %cst_156 : f32 to vector<8x16xf32>
    %394 = arith.select %392, %390, %393 : vector<8x16xi1>, vector<8x16xf32>
    %c11_i32_157 = arith.constant 11 : i32
    %395 = tpu.dynamic_rotate %359 by %c11_i32_157 dim 1 : vector<8x16xf32>, i32 -> vector<8x16xf32>
    %cst_158 = arith.constant 0.000000e+00 : f32
    %396 = vector.shape_cast %104 : vector<1x16xi1> to vector<1x16xi1>
    %397 = vector.broadcast %396 : vector<1x16xi1> to vector<8x16xi1>
    %398 = vector.broadcast %cst_158 : f32 to vector<8x16xf32>
    %399 = arith.select %397, %395, %398 : vector<8x16xi1>, vector<8x16xf32>
    %400 = tpu.concatenate %364, %369, %374, %379, %359, %384, %389, %394, %399 in 0 : vector<8x16xf32>, vector<8x16xf32>, vector<8x16xf32>, vector<8x16xf32>, vector<8x16xf32>, vector<8x16xf32>, vector<8x16xf32>, vector<8x16xf32>, vector<8x16xf32> -> vector<72x16xf32>
    %c5 = arith.constant 5 : index
    %c0_159 = arith.constant 0 : index
    %c0_160 = arith.constant 0 : index
    %401 = vector.load %arg2[%c5, %c0_159, %c0_160] : memref<7x8x72xf32, #tpu.memory_space<vmem>>, vector<1x8x72xf32>
    %402 = vector.shape_cast %401 : vector<1x8x72xf32> to vector<8x72xf32>
    %cst_161 = arith.constant dense<0.000000e+00> : vector<8x16xf32>
    %403 = tpu.matmul %402, %400, %cst_161 {dimension_numbers = #tpu.dot_dimension_numbers<[1], [0], [0], [1], [0, 0, 1, 1], [], []>} : vector<8x72xf32>, vector<72x16xf32>, vector<8x16xf32> -> vector<8x16xf32>
    %c5_162 = arith.constant 5 : index
    %c0_163 = arith.constant 0 : index
    %c0_164 = arith.constant 0 : index
    %404 = vector.load %arg3[%c5_162, %c0_163, %c0_164] : memref<7x8x1xf32, #tpu.memory_space<vmem>>, vector<1x8x1xf32>
    %405 = vector.shape_cast %404 : vector<1x8x1xf32> to vector<8x1xf32>
    %406 = vector.broadcast %405 : vector<8x1xf32> to vector<8x16xf32>
    %407 = arith.addf %403, %406 : vector<8x16xf32>
    %cst_165 = arith.constant 0.000000e+00 : f32
    %408 = vector.broadcast %cst_165 : f32 to vector<8x16xf32>
    %409 = arith.maximumf %407, %408 : vector<8x16xf32>
    %c0_166 = arith.constant 0 : index
    %c0_167 = arith.constant 0 : index
    %410 = vector.load %arg7[%c0_166, %c0_167] : memref<16x64xf32, #tpu.memory_space<vmem>>, vector<16x64xf32>
    %cst_168 = arith.constant dense<0.000000e+00> : vector<8x64xf32>
    %411 = tpu.matmul %409, %410, %cst_168 {dimension_numbers = #tpu.dot_dimension_numbers<[1], [0], [0], [1], [0, 0, 1, 1], [], []>} : vector<8x16xf32>, vector<16x64xf32>, vector<8x64xf32> -> vector<8x64xf32>
    %412 = arith.addf %257, %411 : vector<8x64xf32>
    %c9_i32_169 = arith.constant 9 : i32
    %413 = tpu.dynamic_rotate %412 by %c9_i32_169 dim 1 : vector<8x64xf32>, i32 -> vector<8x64xf32>
    %cst_170 = arith.constant 0.000000e+00 : f32
    %414 = vector.shape_cast %46 : vector<1x64xi1> to vector<1x64xi1>
    %415 = vector.broadcast %414 : vector<1x64xi1> to vector<8x64xi1>
    %416 = vector.broadcast %cst_170 : f32 to vector<8x64xf32>
    %417 = arith.select %415, %413, %416 : vector<8x64xi1>, vector<8x64xf32>
    %c8_i32_171 = arith.constant 8 : i32
    %418 = tpu.dynamic_rotate %412 by %c8_i32_171 dim 1 : vector<8x64xf32>, i32 -> vector<8x64xf32>
    %cst_172 = arith.constant 0.000000e+00 : f32
    %419 = vector.shape_cast %48 : vector<1x64xi1> to vector<1x64xi1>
    %420 = vector.broadcast %419 : vector<1x64xi1> to vector<8x64xi1>
    %421 = vector.broadcast %cst_172 : f32 to vector<8x64xf32>
    %422 = arith.select %420, %418, %421 : vector<8x64xi1>, vector<8x64xf32>
    %c7_i32_173 = arith.constant 7 : i32
    %423 = tpu.dynamic_rotate %412 by %c7_i32_173 dim 1 : vector<8x64xf32>, i32 -> vector<8x64xf32>
    %cst_174 = arith.constant 0.000000e+00 : f32
    %424 = vector.shape_cast %53 : vector<1x64xi1> to vector<1x64xi1>
    %425 = vector.broadcast %424 : vector<1x64xi1> to vector<8x64xi1>
    %426 = vector.broadcast %cst_174 : f32 to vector<8x64xf32>
    %427 = arith.select %425, %423, %426 : vector<8x64xi1>, vector<8x64xf32>
    %c1_i32_175 = arith.constant 1 : i32
    %428 = tpu.dynamic_rotate %412 by %c1_i32_175 dim 1 : vector<8x64xf32>, i32 -> vector<8x64xf32>
    %cst_176 = arith.constant 0.000000e+00 : f32
    %429 = vector.shape_cast %55 : vector<1x64xi1> to vector<1x64xi1>
    %430 = vector.broadcast %429 : vector<1x64xi1> to vector<8x64xi1>
    %431 = vector.broadcast %cst_176 : f32 to vector<8x64xf32>
    %432 = arith.select %430, %428, %431 : vector<8x64xi1>, vector<8x64xf32>
    %c63_i32_177 = arith.constant 63 : i32
    %433 = tpu.dynamic_rotate %412 by %c63_i32_177 dim 1 : vector<8x64xf32>, i32 -> vector<8x64xf32>
    %cst_178 = arith.constant 0.000000e+00 : f32
    %434 = vector.shape_cast %57 : vector<1x64xi1> to vector<1x64xi1>
    %435 = vector.broadcast %434 : vector<1x64xi1> to vector<8x64xi1>
    %436 = vector.broadcast %cst_178 : f32 to vector<8x64xf32>
    %437 = arith.select %435, %433, %436 : vector<8x64xi1>, vector<8x64xf32>
    %c57_i32_179 = arith.constant 57 : i32
    %438 = tpu.dynamic_rotate %412 by %c57_i32_179 dim 1 : vector<8x64xf32>, i32 -> vector<8x64xf32>
    %cst_180 = arith.constant 0.000000e+00 : f32
    %439 = vector.shape_cast %62 : vector<1x64xi1> to vector<1x64xi1>
    %440 = vector.broadcast %439 : vector<1x64xi1> to vector<8x64xi1>
    %441 = vector.broadcast %cst_180 : f32 to vector<8x64xf32>
    %442 = arith.select %440, %438, %441 : vector<8x64xi1>, vector<8x64xf32>
    %c56_i32_181 = arith.constant 56 : i32
    %443 = tpu.dynamic_rotate %412 by %c56_i32_181 dim 1 : vector<8x64xf32>, i32 -> vector<8x64xf32>
    %cst_182 = arith.constant 0.000000e+00 : f32
    %444 = vector.shape_cast %64 : vector<1x64xi1> to vector<1x64xi1>
    %445 = vector.broadcast %444 : vector<1x64xi1> to vector<8x64xi1>
    %446 = vector.broadcast %cst_182 : f32 to vector<8x64xf32>
    %447 = arith.select %445, %443, %446 : vector<8x64xi1>, vector<8x64xf32>
    %c55_i32_183 = arith.constant 55 : i32
    %448 = tpu.dynamic_rotate %412 by %c55_i32_183 dim 1 : vector<8x64xf32>, i32 -> vector<8x64xf32>
    %cst_184 = arith.constant 0.000000e+00 : f32
    %449 = vector.shape_cast %69 : vector<1x64xi1> to vector<1x64xi1>
    %450 = vector.broadcast %449 : vector<1x64xi1> to vector<8x64xi1>
    %451 = vector.broadcast %cst_184 : f32 to vector<8x64xf32>
    %452 = arith.select %450, %448, %451 : vector<8x64xi1>, vector<8x64xf32>
    %453 = tpu.concatenate %417, %422, %427, %432, %412, %437, %442, %447, %452 in 0 : vector<8x64xf32>, vector<8x64xf32>, vector<8x64xf32>, vector<8x64xf32>, vector<8x64xf32>, vector<8x64xf32>, vector<8x64xf32>, vector<8x64xf32>, vector<8x64xf32> -> vector<72x64xf32>
    %c6 = arith.constant 6 : index
    %c0_185 = arith.constant 0 : index
    %c0_186 = arith.constant 0 : index
    %454 = vector.load %arg2[%c6, %c0_185, %c0_186] : memref<7x8x72xf32, #tpu.memory_space<vmem>>, vector<1x8x72xf32>
    %455 = vector.shape_cast %454 : vector<1x8x72xf32> to vector<8x72xf32>
    %cst_187 = arith.constant dense<0.000000e+00> : vector<8x64xf32>
    %456 = tpu.matmul %455, %453, %cst_187 {dimension_numbers = #tpu.dot_dimension_numbers<[1], [0], [0], [1], [0, 0, 1, 1], [], []>} : vector<8x72xf32>, vector<72x64xf32>, vector<8x64xf32> -> vector<8x64xf32>
    %c6_188 = arith.constant 6 : index
    %c0_189 = arith.constant 0 : index
    %c0_190 = arith.constant 0 : index
    %457 = vector.load %arg3[%c6_188, %c0_189, %c0_190] : memref<7x8x1xf32, #tpu.memory_space<vmem>>, vector<1x8x1xf32>
    %458 = vector.shape_cast %457 : vector<1x8x1xf32> to vector<8x1xf32>
    %459 = vector.broadcast %458 : vector<8x1xf32> to vector<8x64xf32>
    %460 = arith.addf %456, %459 : vector<8x64xf32>
    %cst_191 = arith.constant 0.000000e+00 : f32
    %461 = vector.broadcast %cst_191 : f32 to vector<8x64xf32>
    %462 = arith.maximumf %460, %461 : vector<8x64xf32>
    %c0_192 = arith.constant 0 : index
    %c0_193 = arith.constant 0 : index
    %463 = vector.load %arg5[%c0_192, %c0_193] : memref<64x256xf32, #tpu.memory_space<vmem>>, vector<64x256xf32>
    %cst_194 = arith.constant dense<0.000000e+00> : vector<8x256xf32>
    %464 = tpu.matmul %462, %463, %cst_194 {dimension_numbers = #tpu.dot_dimension_numbers<[1], [0], [0], [1], [0, 0, 1, 1], [], []>} : vector<8x64xf32>, vector<64x256xf32>, vector<8x256xf32> -> vector<8x256xf32>
    %465 = arith.addf %155, %464 : vector<8x256xf32>
    %c0_195 = arith.constant 0 : index
    %c0_196 = arith.constant 0 : index
    %466 = vector.load %arg8[%c0_195, %c0_196] : memref<8x256xf32, #tpu.memory_space<vmem>>, vector<8x256xf32>
    tpu.vector_store %arg8[%c0_195, %c0_196], %465 {strides = array<i32>} : memref<8x256xf32, #tpu.memory_space<vmem>>, vector<8x256xf32>,
    return
  }
  func.func @transform_0(%arg0: i32) -> (i32, i32) {
    %c0_i32 = arith.constant 0 : i32
    %c0_i32_0 = arith.constant 0 : i32
    return %c0_i32, %arg0 : i32, i32
  }
  func.func @transform_1(%arg0: i32) -> (i32, i32, i32) {
    %c0_i32 = arith.constant 0 : i32
    %c0_i32_0 = arith.constant 0 : i32
    %c0_i32_1 = arith.constant 0 : i32
    %c0_i32_2 = arith.constant 0 : i32
    return %c0_i32, %c0_i32_0, %c0_i32_1 : i32, i32, i32
  }
  func.func @transform_2(%arg0: i32) -> (i32, i32, i32) {
    %c0_i32 = arith.constant 0 : i32
    %c0_i32_0 = arith.constant 0 : i32
    %c0_i32_1 = arith.constant 0 : i32
    %c0_i32_2 = arith.constant 0 : i32
    return %c0_i32, %c0_i32_0, %c0_i32_1 : i32, i32, i32
  }
  func.func @transform_3(%arg0: i32) -> (i32, i32) {
    %c0_i32 = arith.constant 0 : i32
    %c0_i32_0 = arith.constant 0 : i32
    %c0_i32_1 = arith.constant 0 : i32
    return %c0_i32, %c0_i32_0 : i32, i32
  }
  func.func @transform_4(%arg0: i32) -> (i32, i32) {
    %c0_i32 = arith.constant 0 : i32
    %c0_i32_0 = arith.constant 0 : i32
    %c0_i32_1 = arith.constant 0 : i32
    return %c0_i32, %c0_i32_0 : i32, i32
  }
  func.func @transform_5(%arg0: i32) -> (i32, i32) {
    %c0_i32 = arith.constant 0 : i32
    %c0_i32_0 = arith.constant 0 : i32
    %c0_i32_1 = arith.constant 0 : i32
    return %c0_i32, %c0_i32_0 : i32, i32
  }
  func.func @transform_6(%arg0: i32) -> (i32, i32) {
    %c0_i32 = arith.constant 0 : i32
    %c0_i32_0 = arith.constant 0 : i32
    %c0_i32_1 = arith.constant 0 : i32
    return %c0_i32, %c0_i32_0 : i32, i32
  }
  func.func @transform_7(%arg0: i32) -> (i32, i32) {
    %c0_i32 = arith.constant 0 : i32
    %c0_i32_0 = arith.constant 0 : i32
    return %c0_i32, %arg0 : i32, i32
  }
}

</mosaic_0001>

<bundles_post_ra>
// kernel: hourglass_forward.1
= control target key start
LH: loop header
LB: loop body
LE: loop exit
PB: predicated region body
PF: predicated region fallthrough
CT: control target
= control target key end

     0   :  { %s1408_s24 = smov 0   ;;  %s2050_s0 = inlined_call_operand.vmem [shape: f32[8,512], index: 0, kind: input, shape index: {}]   ;;  %s2051_s1 = inlined_call_operand.vmem [shape: f32[7,8,72], index: 1, kind: input, shape index: {}]   ;;  %s2052_s2 = inlined_call_operand.vmem [shape: f32[7,8,1], index: 2, kind: input, shape index: {}]   ;;  %s2053_s3 = inlined_call_operand.vmem [shape: f32[256,64], index: 3, kind: input, shape index: {}]   ;;  %s2054_s4 = inlined_call_operand.vmem [shape: f32[64,256], index: 4, kind: input, shape index: {}]   ;;  %s2055_s5 = inlined_call_operand.vmem [shape: f32[64,16], index: 5, kind: input, shape index: {}]   ;;  %s2056_s6 = inlined_call_operand.vmem [shape: f32[16,64], index: 6, kind: input, shape index: {}]   ;;  %s2057_s7 = inlined_call_operand.vmem [shape: f32[8,512], index: 7, kind: output, shape index: {}]  }
   0x1 LB: > { %s1204_s25 = sadd.s32 4294967295, %s1343_s24   ;;  %p1208_p0 = scmp.ge.s32.totalorder %s1343_s24, 1  ;;  %s1343_s24 = sphi %s1408_s24, %s17_s24  }
   0x2   : > { %p238_p1 = scmp.lt.s32.totalorder %s1343_s24, 3 }
   0x4   : > { %p239_p2 = pnand %p1208_p0, %p238_p1 }
   0x5   : > { %s1209_s14 = sshll.u32 (!%p239_p2), %s1204_s25, 1  ;;  %s1345_s8 = smov (!%p239_p2), 112  }
   0x6   : > { %242 = sbr.rel (%p239_p2) target bundleno = 3016 (0xbc8), region = 48  ;;  %p271_p3 = scmp.lt.s32.totalorder (!%p239_p2), %s1209_s14, 3 }
   0x7   : > { %s1346_s9 = smov (!%p239_p2), 64   ;;  %s1347_s10 = smov (!%p239_p2), 127  }
   0x8   : > { %s1348_s11 = smov (!%p239_p2), 111   ;;  %s1349_s12 = smov (!%p239_p2), 1  }
   0x9   : > { %s1350_s15 = smov (!%p239_p2), 15   ;;  %s1351_s16 = smov (!%p239_p2), 113  }
   0xa   : > { %s1352_s17 = smov (!%p239_p2), 16   ;;  %s1353_s18 = smov (!%p239_p2), 17  }
   0xb   : > { %v503_v0 = vld [vmem:[%s2053_s3 + $0x78] sm:$0xff]  ;;  %v502_v2 = vld [vmem:[%s2053_s3 + $0x70] sm:$0xff]  ;;  %v501_v4 = vld [vmem:[%s2053_s3 + $0x68] sm:$0xff]  ;;  %s2094_s14 = smov (!%p271_p3, %s1209_s14), 3  ;;  %vm2064_vm0 = vcmask 1048064   ;;  %s1354_s19 = smov 72   ;;  %v282_v43 = vlaneseq }
   0xc   : > { %v519_v1 = vld [vmem:[%s2053_s3 + $0xf8] sm:$0xff]  ;;  %520 = vmatpush.msra.mxu2 %v503_v0  ;;  %v518_v3 = vld [vmem:[%s2053_s3 + $0xf0] sm:$0xff]  ;;  %v517_v5 = vld [vmem:[%s2053_s3 + $0xe8] sm:$0xff]  ;;  %s2058_s13 = sshll.u32 %s2094_s14, 3  ;;  %s1355_s20 = smov 71  }
   0xd   : > { %540 = vmatpush.msra.mxu3 %v519_v1  ;;  %v500_v6 = vld [vmem:[%s2053_s3 + $0x60] sm:$0xff]  ;;  %v499_v8 = vld [vmem:[%s2053_s3 + $0x58] sm:$0xff]  ;;  %v498_v10 = vld [vmem:[%s2053_s3 + $0x50] sm:$0xff]  ;;  %s274_s26 = scalar_lea.vmem %s2050_s0, %s2058_s13  ;;  %s1356_s21 = smov 119   ;;  %v1564_v44 = vand.u32 127, %v282_v43 }
   0xe   : > { %521 = vmatpush.msra.mxu2 %v502_v2  ;;  %v516_v7 = vld [vmem:[%s2053_s3 + $0xe0] sm:$0xff]  ;;  %v515_v9 = vld [vmem:[%s2053_s3 + $0xd8] sm:$0xff]  ;;  %v514_v11 = vld [vmem:[%s2053_s3 + $0xd0] sm:$0xff]  ;;  %s1357_s22 = smov 120   ;;  %s1358_s25 = smov 121  }
   0xf   : > { %541 = vmatpush.msra.mxu3 %v518_v3  ;;  %v497_v12 = vld [vmem:[%s2053_s3 + $0x48] sm:$0xff]  ;;  %v496_v14 = vld [vmem:[%s2053_s3 + $0x40] sm:$0xff]  ;;  %v495_v16 = vld [vmem:[%s2053_s3 + $0x38] sm:$0xff]  ;;  %v285_v46 = vand.u32 255, %v1564_v44  ;;  %vm426_vm1 = vcmp.lt.s32.totalorder %v1564_v44, 111  ;;  %v284_v47 = vadd.s32 128, %v1564_v44 }
  0x10   : > { %522 = vmatpush.msra.mxu2 %v501_v4  ;;  %v513_v13 = vld [vmem:[%s2053_s3 + $0xc8] sm:$0xff]  ;;  %v512_v15 = vld [vmem:[%s2053_s3 + $0xc0] sm:$0xff]  ;;  %v511_v17 = vld [vmem:[%s2053_s3 + $0xb8] sm:$0xff]  ;;  %vm413_vm2 = vcmp.lt.s32.totalorder %v1564_v44, 112  ;;  %s1359_s23 = smov 65   ;;  %vm400_vm10 = vcmp.lt.s32.totalorder %v1564_v44, 113 }
  0x11   : > { %542 = vmatpush.msra.mxu3 %v517_v5  ;;  %v494_v18 = vld [vmem:[%s2053_s3 + $0x30] sm:$0xff]  ;;  %v493_v20 = vld [vmem:[%s2053_s3 + $0x28] sm:$0xff]  ;;  %v492_v22 = vld [vmem:[%s2053_s3 + $0x20] sm:$0xff]  ;;  %v1569_v48 = vshra.s32 %v285_v46, 4  ;;  %v1571_v49 = vand.u32 15, %v285_v46  ;;  %v286_v50 = vand.u32 255, %v284_v47 }
  0x12   : > { %523 = vmatpush.msra.mxu2 %v500_v6  ;;  %v510_v19 = vld [vmem:[%s2053_s3 + $0xb0] sm:$0xff]  ;;  %v509_v21 = vld [vmem:[%s2053_s3 + $0xa8] sm:$0xff]  ;;  %v508_v23 = vld [vmem:[%s2053_s3 + $0xa0] sm:$0xff]  ;;  %vm387_vm12 = vcmp.lt.s32.totalorder %v1564_v44, 127  ;;  %vm374_vm15 = vcmp.lt.s32.totalorder %v1564_v44, 1  ;;  %s1362_s13 = smov 125  }
  0x13   : > { %543 = vmatpush.msra.mxu3 %v516_v7  ;;  %v491_v24 = vld [vmem:[%s2053_s3 + $0x18] sm:$0xff]  ;;  %v490_v26 = vld [vmem:[%s2053_s3 + $0x10] sm:$0xff]  ;;  %v489_v28 = vld [vmem:[%s2053_s3 + $0x8] sm:$0xff]  ;;  %vm297_vm3 = vcmp.le.s32.totalorder %v1571_v49, 14  ;;  %vm301_vm4 = vcmp.le.s32.totalorder %v1569_v48, 14  ;;  %v1577_v53 = vshra.s32 %v286_v50, 4 }
  0x14   : > { %524 = vmatpush.msra.mxu2 %v499_v8  ;;  %v507_v25 = vld [vmem:[%s2053_s3 + $0x98] sm:$0xff]  ;;  %v506_v27 = vld [vmem:[%s2053_s3 + $0x90] sm:$0xff]  ;;  %v505_v29 = vld [vmem:[%s2053_s3 + $0x88] sm:$0xff]  ;;  %v1579_v54 = vand.u32 15, %v286_v50  ;;  %vm293_vm9 = vcmp.ge.s32.totalorder %v1571_v49, 1  ;;  %s1363_s30 = smov 124  }
  0x15   : > { %544 = vmatpush.msra.mxu3 %v515_v9  ;;  %v488_v30 = vld [vmem:[%s2053_s3] sm:$0xff]  ;;  %v1524_v33 = vld [vmem:[%s274_s26 + $0x8] sm:$0xff]  ;;  %vm305_vm5 = vmand %vm301_vm4, %vm297_vm3  ;;  %vm302_vm7 = vcmp.le.s32.totalorder %v1577_v53, 14 }
  0x16   : > { %525 = vmatpush.msra.mxu2 %v498_v10  ;;  %v504_v31 = vld [vmem:[%s2053_s3 + $0x80] sm:$0xff]  ;;  %vm298_vm6 = vcmp.le.s32.totalorder %v1579_v54, 14  ;;  %vm294_vm11 = vcmp.ge.s32.totalorder %v1579_v54, 1  ;;  %vm303_vm13 = vmand %vm301_vm4, %vm293_vm9  ;;  %v722_v43 = vld [vmem:[%s2055_s5 + $0x8] sm:$0xff] }
  0x17   : > { %545 = vmatpush.msra.mxu3 %v514_v11  ;;  %v1522_v32 = vld [vmem:[%s274_s26] sm:$0xff]  ;;  %vm306_vm8 = vmand %vm302_vm7, %vm298_vm6  ;;  %s1360_s26 = smov 73  }
  0x18   : > { %526 = vmatpush.msra.mxu2 %v497_v12  ;;  %409 = vrot.lane.b32.xlu2 %v1522_v32, %s1345_s8  ;;  %vm304_vm14 = vmand %vm302_vm7, %vm294_vm11 }
  0x19   : > { %546 = vmatpush.msra.mxu3 %v513_v13  ;;  %422 = vrot.lane.b32.xlu1 %v1522_v32, %s1348_s11 }
  0x1a   : > { %527 = vmatpush.msra.mxu2 %v496_v14 }
  0x1b   : > { %547 = vmatpush.msra.mxu3 %v512_v15 }
  0x1c   : > { %528 = vmatpush.msra.mxu2 %v495_v16 }
  0x1d   : > { %548 = vmatpush.msra.mxu3 %v511_v17  ;;  %v307_v17 = vand.u32 63, %v1564_v44 }
  0x1e   : > { %529 = vmatpush.msra.mxu2 %v494_v18 }
  0x1f   : > { %549 = vmatpush.msra.mxu3 %v510_v19  ;;  %v1656_v18 = vshra.s32 %v307_v17, 3  ;;  %v1658_v19 = vand.u32 7, %v307_v17 }
  0x20   : > { %530 = vmatpush.msra.mxu2 %v493_v20  ;;  %411 = vrot.lane.b32.xlu2 %v1524_v33, %s1345_s8  ;;  %s1364_s8 = smov 123  }
  0x21   : > { %550 = vmatpush.msra.mxu3 %v509_v21  ;;  %424 = vrot.lane.b32.xlu1 %v1524_v33, %s1348_s11  ;;  %s1365_s11 = smov 115   ;;  %v1095_v21 = vld [vmem:[%s2054_s4 + $0x50] sm:$0xff] }
  0x22   : > { %531 = vmatpush.msra.mxu2 %v492_v22 }
  0x23   : > { %551 = vmatpush.msra.mxu3 %v508_v23  ;;  %v435_v23 = vld [vmem:[%s2051_s1] sm:$0xff] }
  0x24   : > { %532 = vmatpush.msra.mxu2 %v491_v24 }
  0x25   : > { %552 = vmatpush.msra.mxu3 %v507_v25  ;;  %v1232_v25 = vld [vmem:[%s2052_s2 + $0x8] sm:$0xff] }
  0x26   : > { %533 = vmatpush.msra.mxu2 %v490_v26  ;;  %v728_v26 = vld [vmem:[%s2055_s5 + $0x38] sm:$0xff] }
  0x27   : > { %553 = vmatpush.msra.mxu3 %v506_v27  ;;  %v1361_v27 = vmov 0  }
  0x28   : > { %534 = vmatpush.msra.mxu2 %v489_v28  ;;  %383 = vrot.lane.b32.xlu2 %v1522_v32, %s1347_s10  ;;  %v1288_v28 = vld [vmem:[%s2051_s1 + $0x30] sm:$0xff] }
  0x29   : > { %554 = vmatpush.msra.mxu3 %v505_v29  ;;  %398 = vrot.lane.b32.xlu1 %v1524_v33, %s1351_s16 }
  0x2a   : > { %535 = vmatpush.msra.mxu2 %v488_v30  ;;  %1334 = vset.pattern.permute.xlu2 %v1361_v27 }
  0x2b   : > { %555 = vmatpush.msra.mxu3 %v504_v31  ;;  %536 = vmatmul.f32.vlgmr.msra.gmra.mxu2 %v1522_v32 }
  0x2c   : > { %556 = vmatmul.f32.vlgmr.msra.gmra.mxu3 %v1524_v33  ;;  %741 = vmatpush.msrb.mxu2 %v728_v26 }
  0x2d   : > { %1335 = vset.pattern.permute.xlu1 %v1361_v27  ;;  %1336 = vset.pattern.permute.xlu0 %v1361_v27  ;;  %v1265_v27 = vld [vmem:[%s2051_s1 + $0x20] sm:$0xff] }
  0x30   : > { %370 = vrot.lane.b32.xlu2 %v1522_v32, %s1349_s12 }
  0x38   : > { %357 = vrot.lane.b32.xlu2 %v1522_v32, %s1350_s15 }
  0x40   : > { %344 = vrot.lane.b32.xlu2 %v1522_v32, %s1352_s17 }
  0x48   : > { %331 = vrot.lane.b32.xlu2 %v1522_v32, %s1353_s18 }
  0x72   : > { %v410_v42 = vpop.permute.xlu2 %409 }
  0x7a   : > { %v412_v52 = vpop.permute.xlu2 %411 }
  0x7b   : > { %v414_v56 = vsel %vm413_vm2, %v410_v42, %v412_v52  ;;  %v415_v58 = vsel %vm413_vm2, %v412_v52, %v410_v42  ;;  %vm361_vm2 = vcmp.lt.s32.totalorder %v1564_v44, 15  ;;  %v723_v42 = vld [vmem:[%s2055_s5 + $0x10] sm:$0xff] }
  0x82   : > { %v384_v59 = vpop.permute.xlu2 %383 }
  0x8a   : > { %v371_v61 = vpop.permute.xlu2 %370 }
  0x8b   : > { %v423_v41 = vpop.permute.xlu1 %422 }
  0x92   : > { %v358_v63 = vpop.permute.xlu2 %357 }
  0x93   : > { %v425_v45 = vpop.permute.xlu1 %424 }
  0x94   : > { %v427_v51 = vsel %vm426_vm1, %v423_v41, %v425_v45  ;;  %v428_v55 = vsel %vm426_vm1, %v425_v45, %v423_v41  ;;  %vm291_vm1 = vcmp.ge.s32.totalorder %v1569_v48, 1  ;;  %v724_v41 = vld [vmem:[%s2055_s5 + $0x18] sm:$0xff]  ;;  %v721_v45 = vld [vmem:[%s2055_s5] sm:$0xff] }
  0x95   : > { %1213 = vmatpush.msk.msra.mxu0 %vm305_vm5, %v427_v51  ;;  %1222 = vmatpush.msk.msra.mxu1 %vm306_vm8, %v428_v55  ;;  %vm299_vm5 = vmand %vm291_vm1, %vm297_vm3  ;;  %vm292_vm8 = vcmp.ge.s32.totalorder %v1577_v53, 1 }
  0x97   : > { %1214 = vmatpush.msk.msra.mxu0 %vm301_vm4, %v414_v56  ;;  %1223 = vmatpush.msk.msra.mxu1 %vm302_vm7, %v415_v58  ;;  %vm348_vm4 = vcmp.lt.s32.totalorder %v1564_v44, 16  ;;  %vm295_vm7 = vmand %vm291_vm1, %vm293_vm9  ;;  %v318_v56 = vand.u32 15, %v1564_v44 }
  0x99   : > { %v1774_v58 = vand.u32 3, %v318_v56 }
  0x9a   : > { %v345_v8 = vpop.permute.xlu2 %344 }
  0x9b   : > { %v399_v1 = vpop.permute.xlu1 %398 }
  0xa2   : > { %v332_v11 = vpop.permute.xlu2 %331 }
  0xae   : > { %v537_v34 = vpop.f32.mrf.mxu2 }
  0xaf   : > { %v557_v35 = vpop.f32.mrf.mxu3 }
  0xb0   : > { %v1530_v36 = vadd.f32 %v557_v35, %v537_v34  ;;  %v1088_v35 = vld [vmem:[%s2054_s4 + $0x18] sm:$0xff] }
  0xb2   : > { %561 = vrot.lane.b32.xlu0 %v1530_v36, %s1346_s9 }
 0x124   : > { %v562_v37 = vpop.permute.xlu0 %561 }
 0x125   : > { %v563_v38 = vsel %vm2064_vm0, %v562_v37, %v1530_v36 }
 0x126   : > { %564 = vrot.lane.b32.xlu0 %v563_v38, %s1346_s9  ;;  %v727_v38 = vld [vmem:[%s2055_s5 + $0x30] sm:$0xff] }
 0x127   : > { %742 = vmatpush.msrb.mxu2 %v727_v38 }
 0x12e   : > { %396 = vrot.lane.b32.xlu0 %v1522_v32, %s1351_s16 }
 0x136   : > { %385 = vrot.lane.b32.xlu0 %v1524_v33, %s1347_s10 }
 0x13e   : > { %372 = vrot.lane.b32.xlu0 %v1524_v33, %s1349_s12  ;;  %s1366_s12 = smov 117  }
 0x146   : > { %359 = vrot.lane.b32.xlu0 %v1524_v33, %s1350_s15  ;;  %s1367_s15 = smov 116  }
 0x14e   : > { %346 = vrot.lane.b32.xlu0 %v1524_v33, %s1352_s17 }
 0x156   : > { %333 = vrot.lane.b32.xlu0 %v1524_v33, %s1353_s18  ;;  %s2092_s18 = sshll.u32 %s2094_s14, 3 }
 0x157   : > { %s280_s29 = scalar_lea.vmem %s2057_s7, %s2092_s18 }
 0x198   : > { %v565_v39 = vpop.permute.xlu0 %564 }
 0x199   : > { %v566_v40 = vsel %vm2064_vm0, %v565_v39, %v1530_v36  ;;  %v726_v39 = vld [vmem:[%s2055_s5 + $0x28] sm:$0xff] }
 0x19a   : > { %576 = vrot.lane.b32.xlu0 %v566_v40, %s1354_s19  ;;  %582 = vrot.lane.b32.xlu2 %v566_v40, %s1355_s20 }
 0x19b   : > { %612 = vrot.lane.b32.xlu1 %v566_v40, %s1356_s21  ;;  %743 = vmatpush.msrb.mxu2 %v726_v39 }
 0x1a0   : > { %v397_v57 = vpop.permute.xlu0 %396 }
 0x1a1   : > { %v401_v2 = vsel %vm400_vm10, %v397_v57, %v399_v1  ;;  %v402_v3 = vsel %vm400_vm10, %v399_v1, %v397_v57  ;;  %vm300_vm10 = vmand %vm292_vm8, %vm298_vm6  ;;  %v1772_v57 = vshra.s32 %v318_v56, 2  ;;  %v1242_v56 = vld [vmem:[%s2051_s1 + $0x10] sm:$0xff] }
 0x1a2   : > { %1215 = vmatpush.msk.msra.mxu0 %vm303_vm13, %v401_v2  ;;  %1224 = vmatpush.msk.msra.mxu1 %vm304_vm14, %v402_v3  ;;  %vm2061_vm14 = vcmp.ge.s32.totalorder %v1658_v19, 1 }
 0x1a3   : > { %606 = vrot.lane.b32.xlu1 %v566_v40, %s1357_s22  ;;  %622 = vperm.xlu2 %1334, %v1232_v25  }
 0x1a8   : > { %v386_v60 = vpop.permute.xlu0 %385 }
 0x1a9   : > { %v388_v4 = vsel %vm387_vm12, %v384_v59, %v386_v60  ;;  %v389_v5 = vsel %vm387_vm12, %v386_v60, %v384_v59  ;;  %vm2063_vm12 = vcmp.le.s32.totalorder %v1656_v18, 6 }
 0x1aa   : > { %1216 = vmatpush.msk.msra.mxu0 %vm297_vm3, %v388_v4  ;;  %1225 = vmatpush.msk.msra.mxu1 %vm298_vm6, %v389_v5  ;;  %vm335_vm3 = vcmp.lt.s32.totalorder %v1564_v44, 17  ;;  %vm2062_vm6 = vcmp.le.s32.totalorder %v1658_v19, 6  ;;  %v1255_v44 = vld [vmem:[%s2052_s2 + $0x18] sm:$0xff] }
 0x1ab   : > { %600 = vrot.lane.b32.xlu1 %v566_v40, %s1358_s25  ;;  %vm1670_vm13 = vmand %vm2063_vm12, %vm2062_vm6 }
 0x1ac   : > { %457 = vmatpush.msra.mxu0 %v1522_v32  ;;  %477 = vmatpush.msra.mxu1 %v1524_v33  ;;  %v1090_v32 = vld [vmem:[%s2054_s4 + $0x28] sm:$0xff] }
 0x1b0   : > { %v373_v62 = vpop.permute.xlu0 %372 }
 0x1b1   : > { %v376_v6 = vsel %vm374_vm15, %v373_v62, %v371_v61  ;;  %v375_v14 = vsel %vm374_vm15, %v371_v61, %v373_v62  ;;  %vm1694_vm15 = vmand %vm2063_vm12, %vm2061_vm14 }
 0x1b2   : > { %1217 = vmatpush.msk.msra.mxu0 %vm293_vm9, %v376_v6  ;;  %1226 = vmatpush.msk.msra.mxu1 %vm294_vm11, %v375_v14  ;;  %vm296_vm9 = vmand %vm292_vm8, %vm294_vm11  ;;  %vm442_vm11 = vcmask 588800   ;;  %v1254_v6 = vld [vmem:[%s2051_s1 + $0x18] sm:$0xff] }
 0x1b3   : > { %594 = vrot.lane.b32.xlu1 %v566_v40, %s1347_s10 }
 0x1b8   : > { %v360_v0 = vpop.permute.xlu0 %359 }
 0x1b9   : > { %v363_v7 = vsel %vm361_vm2, %v360_v0, %v358_v63  ;;  %v362_v15 = vsel %vm361_vm2, %v358_v63, %v360_v0  ;;  %v1276_v63 = vld [vmem:[%s2051_s1 + $0x28] sm:$0xff] }
 0x1ba   : > { %1218 = vmatpush.msk.msra.mxu0 %vm299_vm5, %v363_v7  ;;  %1227 = vmatpush.msk.msra.mxu1 %vm300_vm10, %v362_v15  ;;  %vm2059_vm5 = vcmask 523264  }
 0x1bb   : > { %588 = vrot.lane.b32.xlu1 %v566_v40, %s1359_s23 }
 0x1c0   : > { %v347_v9 = vpop.permute.xlu0 %346 }
 0x1c1   : > { %v350_v10 = vsel %vm348_vm4, %v347_v9, %v345_v8  ;;  %v349_v16 = vsel %vm348_vm4, %v345_v8, %v347_v9 }
 0x1c2   : > { %1219 = vmatpush.msk.msra.mxu0 %vm291_vm1, %v350_v10  ;;  %1228 = vmatpush.msk.msra.mxu1 %vm292_vm8, %v349_v16  ;;  %vm2060_vm1 = vcmp.ge.s32.totalorder %v1656_v18, 1  ;;  %vm326_vm8 = vcmp.le.s32.totalorder %v1772_v57, 2  ;;  %v1266_v16 = vld [vmem:[%s2052_s2 + $0x20] sm:$0xff] }
 0x1c3   : > { %570 = vrot.lane.b32.xlu1 %v566_v40, %s1360_s26  ;;  %vm1708_vm2 = vmand %vm2060_vm1, %vm2062_vm6  ;;  %v725_v40 = vld [vmem:[%s2055_s5 + $0x20] sm:$0xff] }
 0x1c4   : > { %vm1722_vm4 = vmand %vm2060_vm1, %vm2061_vm14  ;;  %744 = vmatpush.msrb.mxu2 %v725_v40 }
 0x1c6   : > { %745 = vmatpush.msrb.mxu2 %v724_v41 }
 0x1c8   : > { %v334_v12 = vpop.permute.xlu0 %333  ;;  %746 = vmatpush.msrb.mxu2 %v723_v42 }
 0x1c9   : > { %v337_v13 = vsel %vm335_vm3, %v334_v12, %v332_v11  ;;  %v336_v20 = vsel %vm335_vm3, %v332_v11, %v334_v12  ;;  %vm753_vm3 = vcmask 1047680  }
 0x1ca   : > { %1220 = vmatpush.msk.msra.mxu0 %vm295_vm7, %v337_v13  ;;  %1229 = vmatpush.msk.msra.mxu1 %vm296_vm9, %v336_v20  ;;  %vm324_vm7 = vcmp.le.s32.totalorder %v1774_v58, 2  ;;  %vm322_vm9 = vcmp.ge.s32.totalorder %v1774_v58, 1  ;;  %v987_v58 = vld [vmem:[%s2056_s6 + $0x8] sm:$0xff] }
 0x1cb   : > { %1221 = vmatmul.msk.f32.vlgmr.msra.gmra.mxu0 %vm442_vm11, %v435_v23  ;;  %1230 = vmatmul.msk.f32.vlgmr.msra.gmra.mxu1 %vm442_vm11, %v435_v23  ;;  %vm1782_vm10 = vmand %vm326_vm8, %vm324_vm7 }
 0x1cc   : > { %747 = vmatpush.msrb.mxu2 %v722_v43 }
 0x1ce   : > { %748 = vmatpush.msrb.mxu2 %v721_v45 }
 0x1d0   : > { %1006 = vmatpush.msra.mxu2 %v987_v58 }
 0x1f4   : > { %v583_v33 = vpop.permute.xlu2 %582 }
 0x1fd   : > { %v623_v47 = vpop.permute.xlu2 %622 }
 0x20c   : > { %v577_v34 = vpop.permute.xlu0 %576 }
 0x20d   : > { %v613_v22 = vpop.permute.xlu1 %612 }
 0x20e   : > { %1233 = vmatpush.msk.msrb.mxu0 %vm1670_vm13, %v613_v22 }
 0x215   : > { %v607_v24 = vpop.permute.xlu1 %606 }
 0x216   : > { %1234 = vmatpush.msk.msrb.mxu0 %vm2063_vm12, %v607_v24 }
 0x21d   : > { %v601_v29 = vpop.permute.xlu1 %600 }
 0x21e   : > { %1235 = vmatpush.msk.msrb.mxu0 %vm1694_vm15, %v601_v29 }
 0x225   : > { %v595_v30 = vpop.permute.xlu1 %594 }
 0x226   : > { %1236 = vmatpush.msk.msrb.mxu0 %vm2062_vm6, %v595_v30 }
 0x228   : > { %639 = vmatpush.msrb.mxu0 %v1530_v36  ;;  %v1231_v36 = vld [vmem:[%s2051_s1 + $0x8] sm:$0xff] }
 0x22d   : > { %v589_v31 = vpop.permute.xlu1 %588 }
 0x22e   : > { %1237 = vmatpush.msk.msrb.mxu0 %vm2061_vm14, %v589_v31 }
 0x230   : > { %1238 = vmatpush.msk.msrb.mxu0 %vm1708_vm2, %v583_v33 }
 0x232   : > { %1239 = vmatpush.msk.msrb.mxu0 %vm2060_vm1, %v577_v34  ;;  %vm321_vm1 = vcmp.ge.s32.totalorder %v1772_v57, 1  ;;  %v986_v57 = vld [vmem:[%s2056_s6] sm:$0xff] }
 0x233   : > { %vm1811_vm14 = vmand %vm321_vm1, %vm324_vm7  ;;  %1007 = vmatpush.msra.mxu2 %v986_v57 }
 0x234   : > { %vm1825_vm6 = vmand %vm321_vm1, %vm322_vm9 }
 0x235   : > { %v571_v37 = vpop.permute.xlu1 %570 }
 0x236   : > { %1240 = vmatpush.msk.msrb.mxu0 %vm1722_vm4, %v571_v37 }
 0x237   : > { %1241 = vmatmul.msk.f32.vlgmr.msrb.gmra.mxu0 %vm442_vm11, %v1231_v36 }
 0x248   : > { %v1753_v46 = vpop.f32.mrf.mxu0  ;;  %v1950_v2 = vpop.f32.mrf.mxu1 }
 0x2b4   : > { %v645_v48 = vpop.f32.mrf.mxu0 }
 0x2b5   : > { %v646_v49 = vadd.f32 %v645_v48, %v623_v47 }
 0x2b7   : > { %v1755_v50 = vmax.f32 %v646_v49, 0.0 }
 0x2b9   : > { %1253 = vmatmul.msk.f32.vlgmr.msrb.gmra.mxu2 %vm2059_vm5, %v1755_v50  ;;  %vm1796_vm5 = vmand %vm326_vm8, %vm322_vm9 }
 0x33c   : > { %v750_v51 = vpop.f32.mrf.mxu2 }
 0x33d   : > { %754 = vrot.lane.b32.xlu0 %v750_v51, %s1352_s17 }
 0x3af   : > { %v755_v52 = vpop.permute.xlu0 %754 }
 0x3b0   : > { %v756_v53 = vsel %vm753_vm3, %v755_v52, %v750_v51 }
 0x3b1   : > { %757 = vrot.lane.b32.xlu1 %v756_v53, %s1352_s17 }
 0x423   : > { %v758_v54 = vpop.permute.xlu1 %757 }
 0x424   : > { %v759_v55 = vsel %vm753_vm3, %v758_v54, %v750_v51  ;;  %v1277_v54 = vld [vmem:[%s2052_s2 + $0x28] sm:$0xff] }
 0x425   : > { %793 = vrot.lane.b32.xlu1 %v759_v55, %s1362_s13  ;;  %799 = vrot.lane.b32.xlu0 %v759_v55, %s1363_s30 }
 0x426   : > { %805 = vrot.lane.b32.xlu2 %v759_v55, %s1364_s8 }
 0x42d   : > { %775 = vrot.lane.b32.xlu1 %v759_v55, %s1365_s11  ;;  %781 = vrot.lane.b32.xlu0 %v759_v55, %s1351_s16 }
 0x42e   : > { %787 = vrot.lane.b32.xlu2 %v759_v55, %s1347_s10 }
 0x435   : > { %763 = vrot.lane.b32.xlu0 %v759_v55, %s1366_s12  ;;  %815 = vperm.xlu1 %1335, %v1255_v44  }
 0x436   : > { %769 = vrot.lane.b32.xlu2 %v759_v55, %s1367_s15 }
 0x480   : > { %v806_v60 = vpop.permute.xlu2 %805 }
 0x481   : > { %1256 = vmatpush.msk.msrb.mxu3 %vm1782_vm10, %v806_v60 }
 0x488   : > { %v788_v0 = vpop.permute.xlu2 %787 }
 0x490   : > { %v770_v4 = vpop.permute.xlu2 %769 }
 0x497   : > { %v794_v61 = vpop.permute.xlu1 %793  ;;  %v800_v62 = vpop.permute.xlu0 %799 }
 0x498   : > { %1257 = vmatpush.msk.msrb.mxu3 %vm326_vm8, %v800_v62 }
 0x49a   : > { %1258 = vmatpush.msk.msrb.mxu3 %vm1796_vm5, %v794_v61 }
 0x49c   : > { %1259 = vmatpush.msk.msrb.mxu3 %vm324_vm7, %v788_v0 }
 0x49e   : > { %832 = vmatpush.msrb.mxu3 %v750_v51 }
 0x49f   : > { %v782_v1 = vpop.permute.xlu0 %781  ;;  %v776_v3 = vpop.permute.xlu1 %775 }
 0x4a0   : > { %1260 = vmatpush.msk.msrb.mxu3 %vm322_vm9, %v782_v1 }
 0x4a2   : > { %1261 = vmatpush.msk.msrb.mxu3 %vm1811_vm14, %v776_v3 }
 0x4a4   : > { %1262 = vmatpush.msk.msrb.mxu3 %vm321_vm1, %v770_v4 }
 0x4a7   : > { %v764_v7 = vpop.permute.xlu0 %763  ;;  %v816_v8 = vpop.permute.xlu1 %815 }
 0x4a8   : > { %1263 = vmatpush.msk.msrb.mxu3 %vm1825_vm6, %v764_v7 }
 0x4a9   : > { %1264 = vmatmul.msk.f32.vlgmr.msrb.gmra.mxu3 %vm442_vm11, %v1254_v6 }
 0x52c   : > { %v838_v9 = vpop.f32.mrf.mxu3 }
 0x52d   : > { %v839_v10 = vadd.f32 %v838_v9, %v816_v8 }
 0x52f   : > { %v841_v11 = vmax.f32 %v839_v10, 0.0 }
 0x531   : > { %842 = vrot.lane.b32.xlu2 %v841_v11, %s1352_s17 }
 0x58b   : > { %v843_v12 = vpop.permute.xlu2 %842 }
 0x58c   : > { %v844_v13 = vsel %vm753_vm3, %v843_v12, %v841_v11 }
 0x58d   : > { %845 = vrot.lane.b32.xlu0 %v844_v13, %s1352_s17 }
 0x5ff   : > { %v846_v14 = vpop.permute.xlu0 %845 }
 0x600   : > { %v847_v15 = vsel %vm753_vm3, %v846_v14, %v841_v11 }
 0x601   : > { %869 = vrot.lane.b32.xlu0 %v847_v15, %s1362_s13  ;;  %873 = vrot.lane.b32.xlu2 %v847_v15, %s1363_s30 }
 0x602   : > { %877 = vrot.lane.b32.xlu1 %v847_v15, %s1364_s8 }
 0x609   : > { %857 = vrot.lane.b32.xlu0 %v847_v15, %s1365_s11  ;;  %861 = vrot.lane.b32.xlu2 %v847_v15, %s1351_s16 }
 0x60a   : > { %865 = vrot.lane.b32.xlu1 %v847_v15, %s1347_s10 }
 0x611   : > { %849 = vrot.lane.b32.xlu2 %v847_v15, %s1366_s12  ;;  %887 = vperm.xlu0 %1336, %v1266_v16  }
 0x612   : > { %853 = vrot.lane.b32.xlu1 %v847_v15, %s1367_s15 }
 0x61a   : > { %649 = vrot.lane.b32.xlu1 %v1755_v50, %s1346_s9 }
 0x65b   : > { %v874_v17 = vpop.permute.xlu2 %873 }
 0x663   : > { %v862_v23 = vpop.permute.xlu2 %861 }
 0x66b   : > { %v850_v29 = vpop.permute.xlu2 %849 }
 0x673   : > { %v870_v22 = vpop.permute.xlu0 %869 }
 0x674   : > { %v878_v20 = vpop.permute.xlu1 %877 }
 0x675   : > { %1267 = vmatpush.msk.msra.mxu0 %vm1782_vm10, %v878_v20  ;;  %v1289_v20 = vld [vmem:[%s2052_s2 + $0x30] sm:$0xff] }
 0x677   : > { %1268 = vmatpush.msk.msra.mxu0 %vm326_vm8, %v874_v17 }
 0x679   : > { %1269 = vmatpush.msk.msra.mxu0 %vm1796_vm5, %v870_v22  ;;  %v436_v22 = vld [vmem:[%s2052_s2] sm:$0xff] }
 0x67b   : > { %v858_v25 = vpop.permute.xlu0 %857 }
 0x67c   : > { %v866_v24 = vpop.permute.xlu1 %865 }
 0x67d   : > { %1270 = vmatpush.msk.msra.mxu0 %vm324_vm7, %v866_v24  ;;  %v1099_v24 = vld [vmem:[%s2054_s4 + $0x70] sm:$0xff] }
 0x67f   : > { %904 = vmatpush.msra.mxu0 %v841_v11 }
 0x681   : > { %1271 = vmatpush.msk.msra.mxu0 %vm322_vm9, %v862_v23 }
 0x683   : > { %1272 = vmatpush.msk.msra.mxu0 %vm1811_vm14, %v858_v25  ;;  %v888_v36 = vpop.permute.xlu0 %887  ;;  %v1100_v25 = vld [vmem:[%s2054_s4 + $0x78] sm:$0xff] }
 0x684   : > { %v854_v26 = vpop.permute.xlu1 %853 }
 0x685   : > { %1273 = vmatpush.msk.msra.mxu0 %vm321_vm1, %v854_v26  ;;  %v1097_v26 = vld [vmem:[%s2054_s4 + $0x60] sm:$0xff] }
 0x687   : > { %1274 = vmatpush.msk.msra.mxu0 %vm1825_vm6, %v850_v29  ;;  %v1096_v29 = vld [vmem:[%s2054_s4 + $0x58] sm:$0xff] }
 0x688   : > { %1275 = vmatmul.msk.f32.vlgmr.msra.gmra.mxu0 %vm442_vm11, %v1265_v27  ;;  %v1098_v27 = vld [vmem:[%s2054_s4 + $0x68] sm:$0xff] }
 0x689   : > { %1112 = vmatpush.msrb.mxu0 %v1099_v24 }
 0x68b   : > { %1113 = vmatpush.msrb.mxu0 %v1097_v26 }
 0x68c   : > { %v650_v30 = vpop.permute.xlu1 %649 }
 0x68d   : > { %v651_v31 = vsel %vm2064_vm0, %v650_v30, %v1755_v50  ;;  %v1093_v30 = vld [vmem:[%s2054_s4 + $0x40] sm:$0xff]  ;;  %1114 = vmatpush.msrb.mxu0 %v1095_v21 }
 0x68e   : > { %652 = vrot.lane.b32.xlu1 %v651_v31, %s1346_s9  ;;  %v1094_v31 = vld [vmem:[%s2054_s4 + $0x48] sm:$0xff] }
 0x68f   : > { %1115 = vmatpush.msrb.mxu0 %v1093_v30 }
 0x700   : > { %v653_v33 = vpop.permute.xlu1 %652 }
 0x701   : > { %v654_v34 = vsel %vm2064_vm0, %v653_v33, %v1755_v50  ;;  %vm2083_vm0 = vcmp.ge.s32.totalorder %v1656_v18, 1  ;;  %v1091_v33 = vld [vmem:[%s2054_s4 + $0x30] sm:$0xff] }
 0x702   : > { %680 = vrot.lane.b32.xlu1 %v654_v34, %s1357_s22  ;;  %684 = vrot.lane.b32.xlu0 %v654_v34, %s1356_s21 }
 0x703   : > { %1116 = vmatpush.msrb.mxu0 %v1091_v33 }
 0x705   : > { %v910_v37 = vpop.f32.mrf.mxu0 }
 0x706   : > { %v911_v38 = vadd.f32 %v910_v37, %v888_v36 }
 0x708   : > { %v913_v39 = vmax.f32 %v911_v38, 0.0 }
 0x70a   : > { %914 = vrot.lane.b32.xlu2 %v913_v39, %s1352_s17  ;;  %664 = vrot.lane.b32.xlu1 %v654_v34, %s1355_s20 }
 0x70b   : > { %672 = vrot.lane.b32.xlu0 %v654_v34, %s1347_s10 }
 0x713   : > { %660 = vrot.lane.b32.xlu0 %v654_v34, %s1354_s19 }
 0x764   : > { %v915_v40 = vpop.permute.xlu2 %914 }
 0x765   : > { %v916_v41 = vsel %vm753_vm3, %v915_v40, %v913_v39 }
 0x766   : > { %917 = vrot.lane.b32.xlu2 %v916_v41, %s1352_s17 }
 0x76e   : > { %676 = vrot.lane.b32.xlu2 %v654_v34, %s1358_s25 }
 0x774   : > { %v685_v42 = vpop.permute.xlu0 %684  ;;  %v681_v43 = vpop.permute.xlu1 %680 }
 0x775   : > { %1244 = vmatpush.msk.msrb.mxu1 %vm1670_vm13, %v685_v42 }
 0x776   : > { %668 = vrot.lane.b32.xlu2 %v654_v34, %s1359_s23 }
 0x777   : > { %1245 = vmatpush.msk.msrb.mxu1 %vm2063_vm12, %v681_v43  ;;  %vm2081_vm12 = vcmp.le.s32.totalorder %v1658_v19, 6  ;;  %v1085_v43 = vld [vmem:[%s2054_s4] sm:$0xff] }
 0x77c   : > { %v665_v52 = vpop.permute.xlu1 %664 }
 0x77d   : > { %v673_v49 = vpop.permute.xlu0 %672 }
 0x785   : > { %v661_v53 = vpop.permute.xlu0 %660 }
 0x7c0   : > { %v918_v45 = vpop.permute.xlu2 %917 }
 0x7c1   : > { %v919_v47 = vsel %vm753_vm3, %v918_v45, %v913_v39  ;;  %vm2082_vm3 = vcmp.ge.s32.totalorder %v1658_v19, 1  ;;  %v1086_v45 = vld [vmem:[%s2054_s4 + $0x8] sm:$0xff] }
 0x7c2   : > { %941 = vrot.lane.b32.xlu2 %v919_v47, %s1362_s13  ;;  %949 = vrot.lane.b32.xlu1 %v919_v47, %s1364_s8 }
 0x7c3   : > { %945 = vrot.lane.b32.xlu0 %v919_v47, %s1363_s30 }
 0x7c8   : > { %v677_v48 = vpop.permute.xlu2 %676 }
 0x7c9   : > { %1246 = vmatpush.msk.msrb.mxu1 %vm1694_vm15, %v677_v48 }
 0x7ca   : > { %656 = vrot.lane.b32.xlu2 %v654_v34, %s1360_s26  ;;  %937 = vrot.lane.b32.xlu1 %v919_v47, %s1347_s10  ;;  %v1092_v34 = vld [vmem:[%s2054_s4 + $0x38] sm:$0xff] }
 0x7cb   : > { %933 = vrot.lane.b32.xlu0 %v919_v47, %s1351_s16  ;;  %1247 = vmatpush.msk.msrb.mxu1 %vm2081_vm12, %v673_v49 }
 0x7cd   : > { %711 = vmatpush.msrb.mxu1 %v1755_v50  ;;  %v1243_v50 = vld [vmem:[%s2052_s2 + $0x10] sm:$0xff] }
 0x7d0   : > { %v669_v51 = vpop.permute.xlu2 %668 }
 0x7d1   : > { %1248 = vmatpush.msk.msrb.mxu1 %vm2082_vm3, %v669_v51 }
 0x7d2   : > { %925 = vrot.lane.b32.xlu2 %v919_v47, %s1367_s15  ;;  %929 = vrot.lane.b32.xlu1 %v919_v47, %s1365_s11 }
 0x7d3   : > { %921 = vrot.lane.b32.xlu0 %v919_v47, %s1366_s12  ;;  %1249 = vmatpush.msk.msrb.mxu1 %vm1708_vm2, %v665_v52 }
 0x7d5   : > { %1250 = vmatpush.msk.msrb.mxu1 %vm2083_vm0, %v661_v53  ;;  %vm988_vm0 = vcmask 130048  }
 0x7da   : > { %694 = vperm.xlu2 %1334, %v1243_v50   ;;  %959 = vperm.xlu1 %1335, %v1277_v54  }
 0x81c   : > { %v942_v55 = vpop.permute.xlu2 %941 }
 0x824   : > { %v657_v60 = vpop.permute.xlu2 %656 }
 0x825   : > { %1251 = vmatpush.msk.msrb.mxu1 %vm1722_vm4, %v657_v60 }
 0x826   : > { %1252 = vmatmul.msk.f32.vlgmr.msrb.gmra.mxu1 %vm442_vm11, %v1242_v56 }
 0x82c   : > { %v926_v59 = vpop.permute.xlu2 %925 }
 0x834   : > { %v950_v44 = vpop.permute.xlu1 %949  ;;  %v695_v9 = vpop.permute.xlu2 %694 }
 0x835   : > { %v946_v61 = vpop.permute.xlu0 %945  ;;  %1278 = vmatpush.msk.msra.mxu1 %vm1782_vm10, %v950_v44 }
 0x837   : > { %1279 = vmatpush.msk.msra.mxu1 %vm326_vm8, %v946_v61 }
 0x839   : > { %1280 = vmatpush.msk.msra.mxu1 %vm1796_vm5, %v942_v55  ;;  %vm2089_vm5 = vcmp.ge.s32.totalorder %v1656_v18, 1 }
 0x83c   : > { %v938_v62 = vpop.permute.xlu1 %937 }
 0x83d   : > { %1281 = vmatpush.msk.msra.mxu1 %vm324_vm7, %v938_v62  ;;  %v934_v0 = vpop.permute.xlu0 %933 }
 0x83f   : > { %976 = vmatpush.msra.mxu1 %v913_v39 }
 0x841   : > { %1282 = vmatpush.msk.msra.mxu1 %vm322_vm9, %v934_v0 }
 0x844   : > { %v930_v1 = vpop.permute.xlu1 %929 }
 0x845   : > { %1283 = vmatpush.msk.msra.mxu1 %vm1811_vm14, %v930_v1  ;;  %v922_v3 = vpop.permute.xlu0 %921  ;;  %vm2087_vm14 = vcmp.le.s32.totalorder %v1658_v19, 6  ;;  %v1089_v19 = vld [vmem:[%s2054_s4 + $0x20] sm:$0xff] }
 0x846   : > { %1117 = vmatpush.msrb.mxu0 %v1089_v19 }
 0x847   : > { %1284 = vmatpush.msk.msra.mxu1 %vm321_vm1, %v926_v59  ;;  %vm2088_vm1 = vmmov %vm2082_vm3 }
 0x849   : > { %1285 = vmatpush.msk.msra.mxu1 %vm1825_vm6, %v922_v3  ;;  %vm2084_vm6 = vcmask 1048064  }
 0x84a   : > { %1286 = vmatmul.msk.f32.vlgmr.msra.gmra.mxu1 %vm442_vm11, %v1276_v63  ;;  %vm2085_vm12 = vmmov %vm2084_vm6 }
 0x84b   : > { %1132 = vmatpush.msrb.mxu1 %v1100_v25 }
 0x84c   : > { %v960_v6 = vpop.permute.xlu1 %959 }
 0x84d   : > { %1133 = vmatpush.msrb.mxu1 %v1098_v27 }
 0x84f   : > { %1134 = vmatpush.msrb.mxu1 %v1096_v29 }
 0x851   : > { %1135 = vmatpush.msrb.mxu1 %v1094_v31 }
 0x853   : > { %1136 = vmatpush.msrb.mxu1 %v1092_v34 }
 0x855   : > { %1137 = vmatpush.msrb.mxu1 %v1090_v32 }
 0x857   : > { %1138 = vmatpush.msrb.mxu1 %v1088_v35 }
 0x859   : > { %1139 = vmatpush.msrb.mxu1 %v1086_v45 }
 0x8a3   : > { %v717_v4 = vpop.f32.mrf.mxu1 }
 0x8a4   : > { %v718_v10 = vadd.f32 %v717_v4, %v695_v9 }
 0x8a6   : > { %v720_v11 = vmax.f32 %v718_v10, 0.0 }
 0x8c7   : > { %v982_v7 = vpop.f32.mrf.mxu1 }
 0x8c8   : > { %v983_v8 = vadd.f32 %v982_v7, %v960_v6 }
 0x8ca   : > { %v985_v5 = vmax.f32 %v983_v8, 0.0 }
 0x8cc   : > { %1287 = vmatmul.msk.f32.vlgmr.msra.gmra.mxu2 %vm988_vm0, %v985_v5 }
 0x94f   : > { %v1009_v12 = vpop.f32.mrf.mxu2 }
 0x950   : > { %v1012_v13 = vadd.f32 %v1009_v12, %v720_v11 }
 0x952   : > { %1013 = vrot.lane.b32.xlu0 %v1012_v13, %s1346_s9 }
 0x9c4   : > { %v1014_v14 = vpop.permute.xlu0 %1013 }
 0x9c5   : > { %v1015_v15 = vsel %vm2084_vm6, %v1014_v14, %v1012_v13 }
 0x9c6   : > { %1016 = vrot.lane.b32.xlu1 %v1015_v15, %s1346_s9 }
 0xa38   : > { %v1017_v16 = vpop.permute.xlu1 %1016 }
 0xa39   : > { %v1018_v17 = vsel %vm2085_vm12, %v1017_v16, %v1012_v13 }
 0xa3a   : > { %1040 = vrot.lane.b32.xlu1 %v1018_v17, %s1358_s25  ;;  %1044 = vrot.lane.b32.xlu0 %v1018_v17, %s1357_s22 }
 0xa3b   : > { %1048 = vrot.lane.b32.xlu2 %v1018_v17, %s1356_s21 }
 0xa42   : > { %1028 = vrot.lane.b32.xlu1 %v1018_v17, %s1355_s20  ;;  %1032 = vrot.lane.b32.xlu0 %v1018_v17, %s1359_s23 }
 0xa43   : > { %1036 = vrot.lane.b32.xlu2 %v1018_v17, %s1347_s10 }
 0xa4a   : > { %1058 = vperm.xlu1 %1335, %v1289_v20   ;;  %1020 = vrot.lane.b32.xlu0 %v1018_v17, %s1360_s26 }
 0xa4b   : > { %1024 = vrot.lane.b32.xlu2 %v1018_v17, %s1354_s19 }
 0xa53   : > { %439 = vperm.xlu2 %1334, %v436_v22  }
 0xa95   : > { %v1049_v23 = vpop.permute.xlu2 %1048 }
 0xa96   : > { %1290 = vmatpush.msk.msra.mxu3 %vm1670_vm13, %v1049_v23  ;;  %vm2086_vm13 = vcmp.le.s32.totalorder %v1656_v18, 6  ;;  %v1087_v18 = vld [vmem:[%s2054_s4 + $0x10] sm:$0xff] }
 0xa97   : > { %1118 = vmatpush.msrb.mxu0 %v1087_v18 }
 0xa99   : > { %1119 = vmatpush.msrb.mxu0 %v1085_v43 }
 0xa9d   : > { %v1037_v38 = vpop.permute.xlu2 %1036 }
 0xaa5   : > { %v1025_v41 = vpop.permute.xlu2 %1024 }
 0xaac   : > { %v1041_v36 = vpop.permute.xlu1 %1040  ;;  %v1045_v37 = vpop.permute.xlu0 %1044 }
 0xaad   : > { %1291 = vmatpush.msk.msra.mxu3 %vm2086_vm13, %v1045_v37  ;;  %v440_v52 = vpop.permute.xlu2 %439 }
 0xaae   : > { %v464_v53 = vadd.f32 %v1753_v46, %v440_v52  ;;  %v484_v50 = vadd.f32 %v1950_v2, %v440_v52 }
 0xaaf   : > { %1292 = vmatpush.msk.msra.mxu3 %vm1694_vm15, %v1041_v36 }
 0xab0   : > { %v486_v54 = vmax.f32 %v464_v53, 0.0  ;;  %v487_v55 = vmax.f32 %v484_v50, 0.0 }
 0xab1   : > { %1293 = vmatpush.msk.msra.mxu3 %vm2087_vm14, %v1037_v38 }
 0xab3   : > { %1075 = vmatpush.msra.mxu3 %v1012_v13 }
 0xab4   : > { %v1033_v39 = vpop.permute.xlu0 %1032  ;;  %v1029_v40 = vpop.permute.xlu1 %1028 }
 0xab5   : > { %1294 = vmatpush.msk.msra.mxu3 %vm2088_vm1, %v1033_v39 }
 0xab7   : > { %1295 = vmatpush.msk.msra.mxu3 %vm1708_vm2, %v1029_v40 }
 0xab9   : > { %1296 = vmatpush.msk.msra.mxu3 %vm2089_vm5, %v1025_v41 }
 0xabc   : > { %v1021_v42 = vpop.permute.xlu0 %1020  ;;  %v1059_v47 = vpop.permute.xlu1 %1058 }
 0xabd   : > { %1297 = vmatpush.msk.msra.mxu3 %vm1722_vm4, %v1021_v42 }
 0xabe   : > { %1298 = vmatmul.msk.f32.vlgmr.msra.gmra.mxu3 %vm442_vm11, %v1288_v28  ;;  %vm2090_vm11 = vcmask 523264  }
 0xabf   : > { %vm2091_vm15 = vmmov %vm2090_vm11 }
 0xb41   : > { %v1081_v48 = vpop.f32.mrf.mxu3 }
 0xb42   : > { %v1082_v49 = vadd.f32 %v1081_v48, %v1059_v47 }
 0xb44   : > { %v1084_v51 = vmax.f32 %v1082_v49, 0.0 }
 0xb46   : > { %1299 = vmatmul.msk.f32.vlgmr.msrb.gmra.mxu0 %vm2090_vm11, %v1084_v51  ;;  %1300 = vmatmul.msk.f32.vlgmr.msrb.gmra.mxu1 %vm2091_vm15, %v1084_v51 }
 0xbc3   : > { %v1121_v56 = vpop.f32.mrf.mxu0  ;;  %v1141_v60 = vpop.f32.mrf.mxu1 }
 0xbc4   : > { %v1144_v44 = vadd.f32 %v1121_v56, %v486_v54  ;;  %v1145_v61 = vadd.f32 %v1141_v60, %v487_v55 }
 0xbc6   : > { %1146 = vst [vmem:[%s280_s29] sm:$0xff] %v1144_v44 }
 0xbc7   : > { %1147 = vst [vmem:[%s280_s29 + $0x8] sm:$0xff] %v1145_v61 }
 0xbc8 PF: > { %s17_s24 = sadd.s32 1, %s1343_s24  }
 0xbc9   : > { %p14_p4 = scmp.ge.s32.totalorder %s17_s24, 4  }
 0xbcb   :  { %16 = sbr.rel (!%p14_p4) target bundleno = 1 (0x1), region = 90 }

</bundles_post_ra>
